<compile_context>
chip_gen: v5e
topology: v5e:2x2
jax: 0.10.0
libtpu: 0.0.40
codegen_flags: <defaults>
</compile_context>

<pallas_src>
import functools

import jax
import jax.numpy as jnp
from jax.experimental import pallas as pl
from jax.experimental.pallas import tpu as pltpu

NUM_HIDDEN = 4
HIDDEN_SIZE = 256
EMBED_CHANNELS = 128
OUT_PAD = 128          # lane-dense padded output width
MAX_POSITIONS = 10000
MAX_TILE_M = 1024


def _round_up(n, m):
    return (n + m - 1) // m * m


def _cdiv(a, b):
    return -(-a // b)


def positional_freqs(num_channels=EMBED_CHANNELS, max_positions=MAX_POSITIONS,
                     endpoint=True):
    # PositionalEmbedding(num_channels=128, endpoint=True) frequency table.
    half = num_channels // 2
    e = jnp.arange(half, dtype=jnp.float32) / (half - (1 if endpoint else 0))
    return (1.0 / max_positions) ** e          # (half,)


def fused_freqs_phase():
    """(1,128) duplicated freqs + (1,128) phase so cos(p*f + phase) = [cos | sin]."""
    f = positional_freqs()
    half = EMBED_CHANNELS // 2
    freqs128 = jnp.concatenate([f, f])[None, :]
    phase128 = jnp.concatenate(
        [jnp.zeros((half,), jnp.float32),
         jnp.full((half,), -jnp.pi / 2, jnp.float32)])[None, :]
    return freqs128, phase128


def _silu(z, use_bf16):
    # silu(z) = z*sigmoid(z) = 0.5*z*(1+tanh(z/2)) -> one EUP op, no divide.
    if use_bf16:
        z = z.astype(jnp.bfloat16)
    return 0.5 * z * (1.0 + jnp.tanh(0.5 * z))


def mlp_kernel(x_ref, p_ref, freqs_ref, phase_ref,
               w_x_ref, w_cs_ref, b_in_ref,
               wh_ref, bh_ref, w_out_ref, b_out_ref, o_ref, *, use_bf16):
    f32 = jnp.float32

    # --- fused positional embedding: one 128-lane cos pass gives [cos | sin] ---
    arg = p_ref[...] * freqs_ref[...] + phase_ref[...]          # (TM,1)*(1,128)+(1,128)
    emb = jnp.cos(arg).astype(jnp.bfloat16)                     # (TM,128) bf16
    xb = x_ref[...].astype(jnp.bfloat16)                        # (TM,16)  bf16

    # map_input: x rows (K=16) + [cos|sin] rows (K=128), f32 accumulation, then silu.
    z = (jnp.dot(xb, w_x_ref[...], preferred_element_type=f32)
         + jnp.dot(emb, w_cs_ref[...], preferred_element_type=f32)
         + b_in_ref[...])
    h = _silu(z, use_bf16)

    # hidden layers: Linear -> Dropout -> silu
    # TODO(synk): training-mode dropout (p=0.1) not implemented; eval-mode identity.
    for i in range(NUM_HIDDEN):
        hm = h if use_bf16 else h.astype(jnp.bfloat16)
        z = jnp.dot(hm, wh_ref[i], preferred_element_type=f32) + bh_ref[i]
        h = _silu(z, use_bf16)

    # map_output (lane-padded to 128 columns) + tanh, stored bf16 lane-dense.
    hm = h if use_bf16 else h.astype(jnp.bfloat16)
    y = jnp.dot(hm, w_out_ref[...], preferred_element_type=f32) + b_out_ref[...]
    o_ref[...] = jnp.tanh(y).astype(o_ref.dtype)


def _use_bf16_eup():
    # bf16 VPU/EUP exists on v6e/v7x; keep f32 activations on v5e and older.
    try:
        kind = jax.devices()[0].device_kind.lower()
    except Exception:
        return True
    return not any(t in kind for t in ("v2", "v3", "v4", "v5"))


def _choose_tile_m(B, max_tile=MAX_TILE_M):
    B = max(int(B), 1)
    if B <= 16:
        return _round_up(B, 8)          # single tile == full (padded) array
    # >= 2 grid steps so both TensorCores on a dual-TC chip (v7x) get work;
    # tiles rounded to 16 rows (bf16 sublane pack), capped at max_tile.
    n_tiles = max(2, _cdiv(B, max_tile))
    return min(max_tile, _round_up(_cdiv(B, n_tiles), 16))


def mlp_forward(x, p, params, tile_m=None, use_bf16=None):
    B, d_x = x.shape
    d_out = params["w_out"].shape[1]
    if use_bf16 is None:
        use_bf16 = _use_bf16_eup()
    if tile_m is None:
        tile_m = _choose_tile_m(B)

    b_pad = _round_up(max(B, 1), tile_m)
    grid = (b_pad // tile_m,)

    x_p = jnp.zeros((b_pad, d_x), jnp.float32).at[:B].set(x.astype(jnp.float32))
    p_p = jnp.zeros((b_pad, 1), jnp.float32).at[:B, 0].set(p.astype(jnp.float32))
    freqs128, phase128 = fused_freqs_phase()

    # map_input weight split: rows [0:16] multiply x, rows [16:144] multiply [cos|sin].
    w_in = params["w_in"]
    w_x = w_in[:d_x]                       # (16, 256)
    w_cs = w_in[d_x:]                      # (128, 256)  ([cos rows ; sin rows])

    # Lane-dense output: pad W_out / b_out to 128 columns (tanh(0)=0 in padding).
    w_out_p = jnp.zeros((HIDDEN_SIZE, OUT_PAD), params["w_out"].dtype
                        ).at[:, :d_out].set(params["w_out"])
    b_out_p = jnp.zeros((1, OUT_PAD), jnp.float32).at[:, :d_out].set(params["b_out"])

    flops = 2 * b_pad * (d_x * HIDDEN_SIZE + EMBED_CHANNELS * HIDDEN_SIZE
                         + NUM_HIDDEN * HIDDEN_SIZE * HIDDEN_SIZE
                         + HIDDEN_SIZE * OUT_PAD)
    transcendentals = b_pad * (EMBED_CHANNELS                  # fused cos
                               + (NUM_HIDDEN + 1) * HIDDEN_SIZE  # silu tanh
                               + OUT_PAD)                      # output tanh
    weight_bytes = int(w_in.size * w_in.dtype.itemsize
                       + params["b_in"].size * 4
                       + params["wh"].size * params["wh"].dtype.itemsize
                       + params["bh"].size * 4
                       + w_out_p.size * w_out_p.dtype.itemsize
                       + b_out_p.size * 4)
    bytes_accessed = int(b_pad * (d_x + 1) * 4 + b_pad * OUT_PAD * 2 + weight_bytes)

    kernel = functools.partial(mlp_kernel, use_bf16=use_bf16)
    out = pl.pallas_call(
        kernel,
        out_shape=jax.ShapeDtypeStruct((b_pad, OUT_PAD), jnp.bfloat16),
        grid=grid,
        in_specs=[
            pl.BlockSpec((tile_m, d_x), lambda i: (i, 0)),                   # x tile
            pl.BlockSpec((tile_m, 1), lambda i: (i, 0)),                     # p tile
            pl.BlockSpec((1, EMBED_CHANNELS), lambda i: (0, 0)),             # freqs (dup)
            pl.BlockSpec((1, EMBED_CHANNELS), lambda i: (0, 0)),             # phase
            pl.BlockSpec((d_x, HIDDEN_SIZE), lambda i: (0, 0)),              # W_in[x rows]
            pl.BlockSpec((EMBED_CHANNELS, HIDDEN_SIZE), lambda i: (0, 0)),   # W_in[cos|sin]
            pl.BlockSpec((1, HIDDEN_SIZE), lambda i: (0, 0)),                # b_in
            pl.BlockSpec((NUM_HIDDEN, HIDDEN_SIZE, HIDDEN_SIZE),
                         lambda i: (0, 0, 0)),                               # W_hidden
            pl.BlockSpec((NUM_HIDDEN, 1, HIDDEN_SIZE), lambda i: (0, 0, 0)), # b_hidden
            pl.BlockSpec((HIDDEN_SIZE, OUT_PAD), lambda i: (0, 0)),          # W_out (pad)
            pl.BlockSpec((1, OUT_PAD), lambda i: (0, 0)),                    # b_out (pad)
        ],
        out_specs=pl.BlockSpec((tile_m, OUT_PAD), lambda i: (i, 0)),
        compiler_params=pltpu.CompilerParams(
            dimension_semantics=("parallel",)),
        cost_estimate=pl.CostEstimate(flops=int(flops),
                                      transcendentals=int(transcendentals),
                                      bytes_accessed=bytes_accessed),
    )(x_p, p_p, freqs128, phase128, w_x, w_cs, params["b_in"],
      params["wh"], params["bh"], w_out_p, b_out_p)

    # x.reshape((-1, output_dimension)) is a no-op on (B, d*d).
    return out[:B, :d_out].astype(jnp.float32)


def mlp_reference(x, p, params, use_bf16=None):
    # Pure-JAX reference mirroring the kernel numerics (bf16 MXU operands,
    # f32 accumulation, fused cos/sin, tanh-form silu, bf16 output).
    if use_bf16 is None:
        use_bf16 = _use_bf16_eup()
    d_x = x.shape[1]
    freqs128, phase128 = fused_freqs_phase()
    arg = p.astype(jnp.float32)[:, None] * freqs128 + phase128
    emb = jnp.cos(arg).astype(jnp.bfloat16)                     # [cos | sin]
    xb = x.astype(jnp.bfloat16)
    w_in = params["w_in"]
    z = (jnp.dot(xb, w_in[:d_x], preferred_element_type=jnp.float32)
         + jnp.dot(emb, w_in[d_x:], preferred_element_type=jnp.float32)
         + params["b_in"])
    h = _silu(z, use_bf16)
    for i in range(NUM_HIDDEN):
        hm = h if use_bf16 else h.astype(jnp.bfloat16)
        z = jnp.dot(hm, params["wh"][i],
                    preferred_element_type=jnp.float32) + params["bh"][i]
        h = _silu(z, use_bf16)
    hm = h if use_bf16 else h.astype(jnp.bfloat16)
    y = jnp.dot(hm, params["w_out"],
                preferred_element_type=jnp.float32) + params["b_out"]
    return jnp.tanh(y).astype(jnp.bfloat16).astype(jnp.float32)


def init_params(key, d, hidden_size=HIDDEN_SIZE,
                embedding_channels=EMBED_CHANNELS, num_hidden=NUM_HIDDEN):
    din = d * d + embedding_channels
    dout = d * d
    k = jax.random.split(key, 6)
    scale = 0.05
    bf = jnp.bfloat16
    return {
        "w_in": (jax.random.normal(k[0], (din, hidden_size), jnp.float32) * scale).astype(bf),
        "b_in": jax.random.normal(k[1], (1, hidden_size), jnp.float32) * scale,
        "wh": (jax.random.normal(
            k[2], (num_hidden, hidden_size, hidden_size), jnp.float32) * scale).astype(bf),
        "bh": jax.random.normal(
            k[3], (num_hidden, 1, hidden_size), jnp.float32) * scale,
        "w_out": (jax.random.normal(k[4], (hidden_size, dout), jnp.float32) * scale).astype(bf),
        "b_out": jax.random.normal(k[5], (1, dout), jnp.float32) * scale,
    }


if __name__ == "__main__":
    d = 4           # state side length -> d*d = 16 features
    batch = 2

    key = jax.random.PRNGKey(0)
    kp, kx, kpnoise = jax.random.split(key, 3)
    params = init_params(kp, d)

    x = jax.random.normal(kx, (batch, d * d), jnp.float32)
    p = jax.random.uniform(kpnoise, (batch,), jnp.float32)   # per-sample noise level

    out = jax.block_until_ready(mlp_forward(x, p, params))
    ref = jax.block_until_ready(mlp_reference(x, p, params))

    assert out.shape == (batch, d * d), out.shape
    assert jnp.allclose(out, ref, atol=5e-3, rtol=5e-3), \
        float(jnp.max(jnp.abs(out - ref)))
    print("KERNEL_OK")
</pallas_src>

<mosaic_0001>
module attributes {stable_mosaic.version = 11 : i64} {
  func.func @mlp_kernel(%arg0: i32, %arg1: memref<8x16xf32, #tpu.memory_space<vmem>>, %arg2: memref<8x1xf32, #tpu.memory_space<vmem>>, %arg3: memref<1x128xf32, #tpu.memory_space<vmem>>, %arg4: memref<1x128xf32, #tpu.memory_space<vmem>>, %arg5: memref<16x256xbf16, #tpu.memory_space<vmem>>, %arg6: memref<128x256xbf16, #tpu.memory_space<vmem>>, %arg7: memref<1x256xf32, #tpu.memory_space<vmem>>, %arg8: memref<4x256x256xbf16, #tpu.memory_space<vmem>>, %arg9: memref<4x1x256xf32, #tpu.memory_space<vmem>>, %arg10: memref<256x128xbf16, #tpu.memory_space<vmem>>, %arg11: memref<1x128xf32, #tpu.memory_space<vmem>>, %arg12: memref<8x128xbf16, #tpu.memory_space<vmem>>) attributes {dimension_semantics = [#tpu.dimension_semantics<parallel>], iteration_bounds = array<i64: 1>, scalar_prefetch = 0 : i64, scratch_operands = 0 : i64, tpu.core_type = #tpu.core_type<tc>, window_params = [{transform_indices = @transform_0, window_bounds = array<i64: 8, 16>}, {transform_indices = @transform_1, window_bounds = array<i64: 8, 1>}, {pipeline_mode = #tpu.pipeline_mode<synchronous>, transform_indices = @transform_2, window_bounds = array<i64: 1, 128>}, {pipeline_mode = #tpu.pipeline_mode<synchronous>, transform_indices = @transform_3, window_bounds = array<i64: 1, 128>}, {pipeline_mode = #tpu.pipeline_mode<synchronous>, transform_indices = @transform_4, window_bounds = array<i64: 16, 256>}, {pipeline_mode = #tpu.pipeline_mode<synchronous>, transform_indices = @transform_5, window_bounds = array<i64: 128, 256>}, {pipeline_mode = #tpu.pipeline_mode<synchronous>, transform_indices = @transform_6, window_bounds = array<i64: 1, 256>}, {pipeline_mode = #tpu.pipeline_mode<synchronous>, transform_indices = @transform_7, window_bounds = array<i64: 4, 256, 256>}, {pipeline_mode = #tpu.pipeline_mode<synchronous>, transform_indices = @transform_8, window_bounds = array<i64: 4, 1, 256>}, {pipeline_mode = #tpu.pipeline_mode<synchronous>, transform_indices = @transform_9, window_bounds = array<i64: 256, 128>}, {pipeline_mode = #tpu.pipeline_mode<synchronous>, transform_indices = @transform_10, window_bounds = array<i64: 1, 128>}, {transform_indices = @transform_11, window_bounds = array<i64: 8, 128>}]} {
    %c0 = arith.constant 0 : index
    %c0_0 = arith.constant 0 : index
    %0 = vector.load %arg2[%c0, %c0_0] : memref<8x1xf32, #tpu.memory_space<vmem>>, vector<8x1xf32>
    %c0_1 = arith.constant 0 : index
    %c0_2 = arith.constant 0 : index
    %1 = vector.load %arg3[%c0_1, %c0_2] : memref<1x128xf32, #tpu.memory_space<vmem>>, vector<1x128xf32>
    %2 = vector.broadcast %0 : vector<8x1xf32> to vector<8x128xf32>
    %3 = vector.broadcast %1 : vector<1x128xf32> to vector<8x128xf32>
    %4 = arith.mulf %2, %3 : vector<8x128xf32>
    %c0_3 = arith.constant 0 : index
    %c0_4 = arith.constant 0 : index
    %5 = vector.load %arg4[%c0_3, %c0_4] : memref<1x128xf32, #tpu.memory_space<vmem>>, vector<1x128xf32>
    %6 = vector.broadcast %5 : vector<1x128xf32> to vector<8x128xf32>
    %7 = arith.addf %4, %6 : vector<8x128xf32>
    %8 = math.cos %7 : vector<8x128xf32>
    %9 = arith.truncf %8 : vector<8x128xf32> to vector<8x128xbf16>
    %c0_5 = arith.constant 0 : index
    %c0_6 = arith.constant 0 : index
    %10 = vector.load %arg1[%c0_5, %c0_6] : memref<8x16xf32, #tpu.memory_space<vmem>>, vector<8x16xf32>
    %11 = arith.truncf %10 : vector<8x16xf32> to vector<8x16xbf16>
    %c0_7 = arith.constant 0 : index
    %c0_8 = arith.constant 0 : index
    %12 = vector.load %arg5[%c0_7, %c0_8] : memref<16x256xbf16, #tpu.memory_space<vmem>>, vector<16x256xbf16>
    %cst = arith.constant dense<0.000000e+00> : vector<8x256xf32>
    %13 = tpu.matmul %11, %12, %cst {dimension_numbers = #tpu.dot_dimension_numbers<[1], [0], [0], [1], [0, 0, 1, 1], [], []>} : vector<8x16xbf16>, vector<16x256xbf16>, vector<8x256xf32> -> vector<8x256xf32>
    %c0_9 = arith.constant 0 : index
    %c0_10 = arith.constant 0 : index
    %14 = vector.load %arg6[%c0_9, %c0_10] : memref<128x256xbf16, #tpu.memory_space<vmem>>, vector<128x256xbf16>
    %cst_11 = arith.constant dense<0.000000e+00> : vector<8x256xf32>
    %15 = tpu.matmul %9, %14, %cst_11 {dimension_numbers = #tpu.dot_dimension_numbers<[1], [0], [0], [1], [0, 0, 1, 1], [], []>} : vector<8x128xbf16>, vector<128x256xbf16>, vector<8x256xf32> -> vector<8x256xf32>
    %16 = arith.addf %13, %15 : vector<8x256xf32>
    %c0_12 = arith.constant 0 : index
    %c0_13 = arith.constant 0 : index
    %17 = vector.load %arg7[%c0_12, %c0_13] : memref<1x256xf32, #tpu.memory_space<vmem>>, vector<1x256xf32>
    %18 = vector.broadcast %17 : vector<1x256xf32> to vector<8x256xf32>
    %19 = arith.addf %16, %18 : vector<8x256xf32>
    %20 = arith.truncf %19 : vector<8x256xf32> to vector<8x256xbf16>
    %cst_14 = arith.constant 5.000000e-01 : bf16
    %21 = vector.broadcast %cst_14 : bf16 to vector<8x256xbf16>
    %22 = arith.mulf %21, %20 : vector<8x256xbf16>
    %cst_15 = arith.constant 5.000000e-01 : bf16
    %23 = vector.broadcast %cst_15 : bf16 to vector<8x256xbf16>
    %24 = arith.mulf %23, %20 : vector<8x256xbf16>
    %25 = math.tanh %24 : vector<8x256xbf16>
    %cst_16 = arith.constant 1.000000e+00 : bf16
    %26 = vector.broadcast %cst_16 : bf16 to vector<8x256xbf16>
    %27 = arith.addf %26, %25 : vector<8x256xbf16>
    %28 = arith.mulf %22, %27 : vector<8x256xbf16>
    %c0_17 = arith.constant 0 : index
    %c0_18 = arith.constant 0 : index
    %c0_19 = arith.constant 0 : index
    %29 = vector.load %arg8[%c0_17, %c0_18, %c0_19] : memref<4x256x256xbf16, #tpu.memory_space<vmem>>, vector<1x256x256xbf16>
    %30 = vector.shape_cast %29 : vector<1x256x256xbf16> to vector<256x256xbf16>
    %cst_20 = arith.constant dense<0.000000e+00> : vector<8x256xf32>
    %31 = tpu.matmul %28, %30, %cst_20 {dimension_numbers = #tpu.dot_dimension_numbers<[1], [0], [0], [1], [0, 0, 1, 1], [], []>} : vector<8x256xbf16>, vector<256x256xbf16>, vector<8x256xf32> -> vector<8x256xf32>
    %c0_21 = arith.constant 0 : index
    %c0_22 = arith.constant 0 : index
    %c0_23 = arith.constant 0 : index
    %32 = vector.load %arg9[%c0_21, %c0_22, %c0_23] : memref<4x1x256xf32, #tpu.memory_space<vmem>>, vector<1x1x256xf32>
    %33 = vector.shape_cast %32 : vector<1x1x256xf32> to vector<1x256xf32>
    %34 = vector.broadcast %33 : vector<1x256xf32> to vector<8x256xf32>
    %35 = arith.addf %31, %34 : vector<8x256xf32>
    %36 = arith.truncf %35 : vector<8x256xf32> to vector<8x256xbf16>
    %cst_24 = arith.constant 5.000000e-01 : bf16
    %37 = vector.broadcast %cst_24 : bf16 to vector<8x256xbf16>
    %38 = arith.mulf %37, %36 : vector<8x256xbf16>
    %cst_25 = arith.constant 5.000000e-01 : bf16
    %39 = vector.broadcast %cst_25 : bf16 to vector<8x256xbf16>
    %40 = arith.mulf %39, %36 : vector<8x256xbf16>
    %41 = math.tanh %40 : vector<8x256xbf16>
    %cst_26 = arith.constant 1.000000e+00 : bf16
    %42 = vector.broadcast %cst_26 : bf16 to vector<8x256xbf16>
    %43 = arith.addf %42, %41 : vector<8x256xbf16>
    %44 = arith.mulf %38, %43 : vector<8x256xbf16>
    %c1 = arith.constant 1 : index
    %c0_27 = arith.constant 0 : index
    %c0_28 = arith.constant 0 : index
    %45 = vector.load %arg8[%c1, %c0_27, %c0_28] : memref<4x256x256xbf16, #tpu.memory_space<vmem>>, vector<1x256x256xbf16>
    %46 = vector.shape_cast %45 : vector<1x256x256xbf16> to vector<256x256xbf16>
    %cst_29 = arith.constant dense<0.000000e+00> : vector<8x256xf32>
    %47 = tpu.matmul %44, %46, %cst_29 {dimension_numbers = #tpu.dot_dimension_numbers<[1], [0], [0], [1], [0, 0, 1, 1], [], []>} : vector<8x256xbf16>, vector<256x256xbf16>, vector<8x256xf32> -> vector<8x256xf32>
    %c1_30 = arith.constant 1 : index
    %c0_31 = arith.constant 0 : index
    %c0_32 = arith.constant 0 : index
    %48 = vector.load %arg9[%c1_30, %c0_31, %c0_32] : memref<4x1x256xf32, #tpu.memory_space<vmem>>, vector<1x1x256xf32>
    %49 = vector.shape_cast %48 : vector<1x1x256xf32> to vector<1x256xf32>
    %50 = vector.broadcast %49 : vector<1x256xf32> to vector<8x256xf32>
    %51 = arith.addf %47, %50 : vector<8x256xf32>
    %52 = arith.truncf %51 : vector<8x256xf32> to vector<8x256xbf16>
    %cst_33 = arith.constant 5.000000e-01 : bf16
    %53 = vector.broadcast %cst_33 : bf16 to vector<8x256xbf16>
    %54 = arith.mulf %53, %52 : vector<8x256xbf16>
    %cst_34 = arith.constant 5.000000e-01 : bf16
    %55 = vector.broadcast %cst_34 : bf16 to vector<8x256xbf16>
    %56 = arith.mulf %55, %52 : vector<8x256xbf16>
    %57 = math.tanh %56 : vector<8x256xbf16>
    %cst_35 = arith.constant 1.000000e+00 : bf16
    %58 = vector.broadcast %cst_35 : bf16 to vector<8x256xbf16>
    %59 = arith.addf %58, %57 : vector<8x256xbf16>
    %60 = arith.mulf %54, %59 : vector<8x256xbf16>
    %c2 = arith.constant 2 : index
    %c0_36 = arith.constant 0 : index
    %c0_37 = arith.constant 0 : index
    %61 = vector.load %arg8[%c2, %c0_36, %c0_37] : memref<4x256x256xbf16, #tpu.memory_space<vmem>>, vector<1x256x256xbf16>
    %62 = vector.shape_cast %61 : vector<1x256x256xbf16> to vector<256x256xbf16>
    %cst_38 = arith.constant dense<0.000000e+00> : vector<8x256xf32>
    %63 = tpu.matmul %60, %62, %cst_38 {dimension_numbers = #tpu.dot_dimension_numbers<[1], [0], [0], [1], [0, 0, 1, 1], [], []>} : vector<8x256xbf16>, vector<256x256xbf16>, vector<8x256xf32> -> vector<8x256xf32>
    %c2_39 = arith.constant 2 : index
    %c0_40 = arith.constant 0 : index
    %c0_41 = arith.constant 0 : index
    %64 = vector.load %arg9[%c2_39, %c0_40, %c0_41] : memref<4x1x256xf32, #tpu.memory_space<vmem>>, vector<1x1x256xf32>
    %65 = vector.shape_cast %64 : vector<1x1x256xf32> to vector<1x256xf32>
    %66 = vector.broadcast %65 : vector<1x256xf32> to vector<8x256xf32>
    %67 = arith.addf %63, %66 : vector<8x256xf32>
    %68 = arith.truncf %67 : vector<8x256xf32> to vector<8x256xbf16>
    %cst_42 = arith.constant 5.000000e-01 : bf16
    %69 = vector.broadcast %cst_42 : bf16 to vector<8x256xbf16>
    %70 = arith.mulf %69, %68 : vector<8x256xbf16>
    %cst_43 = arith.constant 5.000000e-01 : bf16
    %71 = vector.broadcast %cst_43 : bf16 to vector<8x256xbf16>
    %72 = arith.mulf %71, %68 : vector<8x256xbf16>
    %73 = math.tanh %72 : vector<8x256xbf16>
    %cst_44 = arith.constant 1.000000e+00 : bf16
    %74 = vector.broadcast %cst_44 : bf16 to vector<8x256xbf16>
    %75 = arith.addf %74, %73 : vector<8x256xbf16>
    %76 = arith.mulf %70, %75 : vector<8x256xbf16>
    %c3 = arith.constant 3 : index
    %c0_45 = arith.constant 0 : index
    %c0_46 = arith.constant 0 : index
    %77 = vector.load %arg8[%c3, %c0_45, %c0_46] : memref<4x256x256xbf16, #tpu.memory_space<vmem>>, vector<1x256x256xbf16>
    %78 = vector.shape_cast %77 : vector<1x256x256xbf16> to vector<256x256xbf16>
    %cst_47 = arith.constant dense<0.000000e+00> : vector<8x256xf32>
    %79 = tpu.matmul %76, %78, %cst_47 {dimension_numbers = #tpu.dot_dimension_numbers<[1], [0], [0], [1], [0, 0, 1, 1], [], []>} : vector<8x256xbf16>, vector<256x256xbf16>, vector<8x256xf32> -> vector<8x256xf32>
    %c3_48 = arith.constant 3 : index
    %c0_49 = arith.constant 0 : index
    %c0_50 = arith.constant 0 : index
    %80 = vector.load %arg9[%c3_48, %c0_49, %c0_50] : memref<4x1x256xf32, #tpu.memory_space<vmem>>, vector<1x1x256xf32>
    %81 = vector.shape_cast %80 : vector<1x1x256xf32> to vector<1x256xf32>
    %82 = vector.broadcast %81 : vector<1x256xf32> to vector<8x256xf32>
    %83 = arith.addf %79, %82 : vector<8x256xf32>
    %84 = arith.truncf %83 : vector<8x256xf32> to vector<8x256xbf16>
    %cst_51 = arith.constant 5.000000e-01 : bf16
    %85 = vector.broadcast %cst_51 : bf16 to vector<8x256xbf16>
    %86 = arith.mulf %85, %84 : vector<8x256xbf16>
    %cst_52 = arith.constant 5.000000e-01 : bf16
    %87 = vector.broadcast %cst_52 : bf16 to vector<8x256xbf16>
    %88 = arith.mulf %87, %84 : vector<8x256xbf16>
    %89 = math.tanh %88 : vector<8x256xbf16>
    %cst_53 = arith.constant 1.000000e+00 : bf16
    %90 = vector.broadcast %cst_53 : bf16 to vector<8x256xbf16>
    %91 = arith.addf %90, %89 : vector<8x256xbf16>
    %92 = arith.mulf %86, %91 : vector<8x256xbf16>
    %c0_54 = arith.constant 0 : index
    %c0_55 = arith.constant 0 : index
    %93 = vector.load %arg10[%c0_54, %c0_55] : memref<256x128xbf16, #tpu.memory_space<vmem>>, vector<256x128xbf16>
    %cst_56 = arith.constant dense<0.000000e+00> : vector<8x128xf32>
    %94 = tpu.matmul %92, %93, %cst_56 {dimension_numbers = #tpu.dot_dimension_numbers<[1], [0], [0], [1], [0, 0, 1, 1], [], []>} : vector<8x256xbf16>, vector<256x128xbf16>, vector<8x128xf32> -> vector<8x128xf32>
    %c0_57 = arith.constant 0 : index
    %c0_58 = arith.constant 0 : index
    %95 = vector.load %arg11[%c0_57, %c0_58] : memref<1x128xf32, #tpu.memory_space<vmem>>, vector<1x128xf32>
    %96 = vector.broadcast %95 : vector<1x128xf32> to vector<8x128xf32>
    %97 = arith.addf %94, %96 : vector<8x128xf32>
    %98 = math.tanh %97 : vector<8x128xf32>
    %99 = arith.truncf %98 : vector<8x128xf32> to vector<8x128xbf16>
    %c0_59 = arith.constant 0 : index
    %c0_60 = arith.constant 0 : index
    %100 = vector.load %arg12[%c0_59, %c0_60] : memref<8x128xbf16, #tpu.memory_space<vmem>>, vector<8x128xbf16>
    tpu.vector_store %arg12[%c0_59, %c0_60], %99 {strides = array<i32>} : memref<8x128xbf16, #tpu.memory_space<vmem>>, vector<8x128xbf16>,
    return
  }
  func.func @transform_0(%arg0: i32) -> (i32, i32) {
    %c0_i32 = arith.constant 0 : i32
    %c0_i32_0 = arith.constant 0 : i32
    return %arg0, %c0_i32 : i32, i32
  }
  func.func @transform_1(%arg0: i32) -> (i32, i32) {
    %c0_i32 = arith.constant 0 : i32
    %c0_i32_0 = arith.constant 0 : i32
    return %arg0, %c0_i32 : i32, i32
  }
  func.func @transform_2(%arg0: i32) -> (i32, i32) {
    %c0_i32 = arith.constant 0 : i32
    %c0_i32_0 = arith.constant 0 : i32
    %c0_i32_1 = arith.constant 0 : i32
    return %c0_i32, %c0_i32_0 : i32, i32
  }
  func.func @transform_3(%arg0: i32) -> (i32, i32) {
    %c0_i32 = arith.constant 0 : i32
    %c0_i32_0 = arith.constant 0 : i32
    %c0_i32_1 = arith.constant 0 : i32
    return %c0_i32, %c0_i32_0 : i32, i32
  }
  func.func @transform_4(%arg0: i32) -> (i32, i32) {
    %c0_i32 = arith.constant 0 : i32
    %c0_i32_0 = arith.constant 0 : i32
    %c0_i32_1 = arith.constant 0 : i32
    return %c0_i32, %c0_i32_0 : i32, i32
  }
  func.func @transform_5(%arg0: i32) -> (i32, i32) {
    %c0_i32 = arith.constant 0 : i32
    %c0_i32_0 = arith.constant 0 : i32
    %c0_i32_1 = arith.constant 0 : i32
    return %c0_i32, %c0_i32_0 : i32, i32
  }
  func.func @transform_6(%arg0: i32) -> (i32, i32) {
    %c0_i32 = arith.constant 0 : i32
    %c0_i32_0 = arith.constant 0 : i32
    %c0_i32_1 = arith.constant 0 : i32
    return %c0_i32, %c0_i32_0 : i32, i32
  }
  func.func @transform_7(%arg0: i32) -> (i32, i32, i32) {
    %c0_i32 = arith.constant 0 : i32
    %c0_i32_0 = arith.constant 0 : i32
    %c0_i32_1 = arith.constant 0 : i32
    %c0_i32_2 = arith.constant 0 : i32
    return %c0_i32, %c0_i32_0, %c0_i32_1 : i32, i32, i32
  }
  func.func @transform_8(%arg0: i32) -> (i32, i32, i32) {
    %c0_i32 = arith.constant 0 : i32
    %c0_i32_0 = arith.constant 0 : i32
    %c0_i32_1 = arith.constant 0 : i32
    %c0_i32_2 = arith.constant 0 : i32
    return %c0_i32, %c0_i32_0, %c0_i32_1 : i32, i32, i32
  }
  func.func @transform_9(%arg0: i32) -> (i32, i32) {
    %c0_i32 = arith.constant 0 : i32
    %c0_i32_0 = arith.constant 0 : i32
    %c0_i32_1 = arith.constant 0 : i32
    return %c0_i32, %c0_i32_0 : i32, i32
  }
  func.func @transform_10(%arg0: i32) -> (i32, i32) {
    %c0_i32 = arith.constant 0 : i32
    %c0_i32_0 = arith.constant 0 : i32
    %c0_i32_1 = arith.constant 0 : i32
    return %c0_i32, %c0_i32_0 : i32, i32
  }
  func.func @transform_11(%arg0: i32) -> (i32, i32) {
    %c0_i32 = arith.constant 0 : i32
    %c0_i32_0 = arith.constant 0 : i32
    return %arg0, %c0_i32 : i32, i32
  }
}

</mosaic_0001>

<bundles_post_ra>
// kernel: tpu_custom_call.1
= control target key start
LH: loop header
LB: loop body
LE: loop exit
PB: predicated region body
PF: predicated region fallthrough
CT: control target
= control target key end

     0   :  { %16 = vsyncpa [#allocation3], 0  ;;  %s3049_s0 = inlined_call_operand.vmem [shape: f32[8,16], index: 0, kind: input, shape index: {}]   ;;  %s3050_s1 = inlined_call_operand.vmem [shape: f32[8,1], index: 1, kind: input, shape index: {}]   ;;  %s3051_s2 = inlined_call_operand.hbm [shape: f32[1,128], index: 2, kind: input, shape index: {}]   ;;  %s3052_s3 = inlined_call_operand.hbm [shape: f32[1,128], index: 3, kind: input, shape index: {}]   ;;  %s3053_s4 = inlined_call_operand.hbm [shape: bf16[16,256], index: 4, kind: input, shape index: {}]   ;;  %s3054_s5 = inlined_call_operand.hbm [shape: bf16[128,256], index: 5, kind: input, shape index: {}]   ;;  %s3055_s6 = inlined_call_operand.hbm [shape: f32[1,256], index: 6, kind: input, shape index: {}]   ;;  %s3056_s7 = inlined_call_operand.hbm [shape: bf16[4,256,256], index: 7, kind: input, shape index: {}]   ;;  %s3057_s8 = inlined_call_operand.vmem [shape: f32[4,1,256], index: 8, kind: input, shape index: {}]   ;;  %s3058_s9 = inlined_call_operand.hbm [shape: bf16[256,128], index: 9, kind: input, shape index: {}]   ;;  %s3059_s10 = inlined_call_operand.vmem [shape: f32[1,128], index: 10, kind: input, shape index: {}]   ;;  %s3060_s11 = inlined_call_operand.hbm [shape: bf16[8,128], index: 11, kind: output, shape index: {}]  }
   0x1   :  { %17 = vsyncpa [#allocation6], 0 }
   0x2   :  { %18 = vsyncpa [#allocation9], 0 }
   0x3   :  { %19 = vsyncpa [#allocation12], 0  ;;  %s41_s19 = sshll.u32 %s3052_s3, 4  ;;  %s42_s19 = int_to_ptr.hbm [resolvable:$true] %s41_s19 }
   0x4   :  { %20 = vsyncpa [#allocation4], 0  ;;  %s2850_s20 = smov [#allocation5]   ;;  %s64_s24 = sshll.u32 %s3054_s5, 4  ;;  %s65_s24 = int_to_ptr.hbm [resolvable:$true] %s64_s24 }
   0x5   :  { %s43_s21 = sshll.u32 %s2850_s20, 4  ;;  %s2851_s25 = smov [#allocation8]   ;;  %s44_s21 = int_to_ptr.vmem [resolvable:$true] %s43_s21 }
   0x6   :  { %46 = dma.hbm_to_vmem [thread:$0]  %s42_s19, 16, %s44_s21, [#allocation6]  }
   0x7   :  { %s66_s26 = sshll.u32 %s2851_s25, 4  ;;  %s88_s29 = sshll.u32 %s3056_s7, 4  ;;  %s67_s26 = int_to_ptr.vmem [resolvable:$true] %s66_s26  ;;  %s89_s29 = int_to_ptr.hbm [resolvable:$true] %s88_s29 }
   0x8   :  { %s2852_s3 = smov 128   ;;  %s2853_s30 = smov 8  }
   0x9   :  { %72 = dma.hbm_to_vmem [thread:$0]  %s65_s24, 2048, %s67_s26, [#allocation9], %s2852_s3, %s2852_s3, %s2853_s30  }
   0xa   :  { %s30_s14 = sshll.u32 %s3051_s2, 4  ;;  %s2854_s15 = smov [#allocation11]   ;;  %s31_s14 = int_to_ptr.hbm [resolvable:$true] %s30_s14 }
   0xb   :  { %s90_s16 = sshll.u32 %s2854_s15, 4  ;;  %s2855_s5 = smov [#allocation2]   ;;  %s91_s16 = int_to_ptr.vmem [resolvable:$true] %s90_s16 }
   0xc   :  { %96 = dma.hbm_to_vmem [thread:$0]  %s89_s29, 16384, %s91_s16, [#allocation12], %s2852_s3, %s2852_s3, %s2853_s30  }
   0xd   :  { %s32_s17 = sshll.u32 %s2855_s5, 4  ;;  %s51_s7 = sshll.u32 %s3053_s4, 4  ;;  %s33_s17 = int_to_ptr.vmem [resolvable:$true] %s32_s17  ;;  %s52_s7 = int_to_ptr.hbm [resolvable:$true] %s51_s7 }
   0xe   :  { %35 = dma.hbm_to_vmem [thread:$0]  %s31_s14, 16, %s33_s17, [#allocation3]  }
   0xf   :  { %s78_s22 = sshll.u32 %s3055_s6, 4  ;;  %s2856_s23 = smov [#allocation7]   ;;  %s79_s22 = int_to_ptr.hbm [resolvable:$true] %s78_s22 }
  0x10   :  { %s53_s2 = sshll.u32 %s2856_s23, 4  ;;  %s2857_s24 = smov [#allocation10]   ;;  %s54_s2 = int_to_ptr.vmem [resolvable:$true] %s53_s2 }
  0x11   :  { %59 = dma.hbm_to_vmem [thread:$0]  %s52_s7, 256, %s54_s2, [#allocation6], %s2852_s3, %s2852_s3, %s2853_s30  }
  0x12   :  { %s80_s25 = sshll.u32 %s2857_s24, 4  ;;  %s103_s28 = sshll.u32 %s3058_s9, 4  ;;  %s81_s25 = int_to_ptr.vmem [resolvable:$true] %s80_s25  ;;  %s104_s28 = int_to_ptr.hbm [resolvable:$true] %s103_s28 }
  0x13   :  { %83 = dma.hbm_to_vmem [thread:$0]  %s79_s22, 32, %s81_s25, [#allocation9]  }
  0x14   :  { %s2858_s4 = smov [#allocation13]   ;;  %s2859_s12 = smov 64  }
  0x15   :  { %s105_s29 = sshll.u32 %s2858_s4, 4  ;;  %s2860_s13 = smov 4   ;;  %s106_s29 = int_to_ptr.vmem [resolvable:$true] %s105_s29 }
  0x16   :  { %111 = dma.hbm_to_vmem [thread:$0]  %s104_s28, 2048, %s106_s29, [#allocation12], %s2859_s12, %s2859_s12, %s2860_s13  }
  0x17   :  { %2840 = dma.done.wait [#allocation3], 16  }
  0x18   :  { %2841 = vsyncadd [#allocation3], 4294967280 }
  0x19   :  { %2842 = dma.done.wait [#allocation6], 272  }
  0x1a   :  { %2843 = vsyncadd [#allocation6], 4294967024 }
  0x1b   :  { %2844 = dma.done.wait [#allocation9], 2080  }
  0x1c   :  { %2845 = vsyncadd [#allocation9], 4294965216 }
  0x1d   :  { %2846 = dma.done.wait [#allocation12], 18432  }
  0x1e   :  { %2847 = vsyncadd [#allocation12], 4294948864  ;;  %v2861_v0 = vmov 0   ;;  %v143_v1 = vld [vmem:[%s3050_s1] sm:$0xff]  ;;  %v2458_v3 = vld [vmem:[#allocation8 + $0x74] sm:$0xf0] }
  0x1f   :  { %2622 = vset.pattern.permute.xlu0 %v2861_v0  ;;  %v1846_v2 = vld [vmem:[#allocation8 + $0x70] sm:$0xf]  ;;  %v2457_v4 = vld [vmem:[#allocation8 + $0x74] sm:$0xf]  ;;  %v1848_v6 = vld [vmem:[#allocation8 + $0x78] sm:$0xf0] }
  0x20   :  { %147 = vperm.xlu0 %2622, %v143_v1   ;;  %v1847_v5 = vor.u32 %v2458_v3, %v1846_v2  ;;  %v1838_v7 = vld [vmem:[#allocation8 + $0x60] sm:$0xf]  ;;  %v2456_v8 = vld [vmem:[#allocation8 + $0x64] sm:$0xf0]  ;;  %v1851_v9 = vor.u32 %v2457_v4, %v1848_v6  ;;  %v2455_v10 = vld [vmem:[#allocation8 + $0x64] sm:$0xf] }
  0x21   :  { %v1840_v11 = vld [vmem:[#allocation8 + $0x68] sm:$0xf0]  ;;  %v1839_v12 = vor.u32 %v2456_v8, %v1838_v7  ;;  %v1830_v14 = vld [vmem:[#allocation8 + $0x50] sm:$0xf]  ;;  %v2454_v15 = vld [vmem:[#allocation8 + $0x54] sm:$0xf0] }
  0x22   :  { %414 = vmatpush.bf16.msra.mxu0 %v1847_v5  ;;  %427 = vmatpush.bf16.msra.mxu1 %v1851_v9  ;;  %v1843_v13 = vor.u32 %v2455_v10, %v1840_v11  ;;  %v2453_v16 = vld [vmem:[#allocation8 + $0x54] sm:$0xf]  ;;  %v1832_v17 = vld [vmem:[#allocation8 + $0x58] sm:$0xf0]  ;;  %v1854_v18 = vld [vmem:[#allocation7] sm:$0xf]  ;;  %v1831_v23 = vor.u32 %v2454_v15, %v1830_v14 }
  0x23   :  { %v2442_v19 = vld [vmem:[#allocation7 + $0x4] sm:$0xf0]  ;;  %v2441_v21 = vld [vmem:[#allocation7 + $0x4] sm:$0xf]  ;;  %v1856_v22 = vld [vmem:[#allocation7 + $0x8] sm:$0xf0]  ;;  %v1835_v25 = vor.u32 %v2453_v16, %v1832_v17 }
  0x24   :  { %v1855_v20 = vor.u32 %v2442_v19, %v1854_v18  ;;  %v1859_v24 = vor.u32 %v2441_v21, %v1856_v22  ;;  %v1822_v26 = vld [vmem:[#allocation8 + $0x40] sm:$0xf]  ;;  %v2452_v27 = vld [vmem:[#allocation8 + $0x44] sm:$0xf0]  ;;  %v314_v28 = vld [vmem:[%s3049_s0] sm:$0xff]  ;;  %vm450_vm0 = vcmask 130048  }
  0x25   :  { %v2451_v29 = vld [vmem:[#allocation8 + $0x44] sm:$0xf]  ;;  %v1824_v30 = vld [vmem:[#allocation8 + $0x48] sm:$0xf0]  ;;  %v315_v31 = vpack.c.bf16 %v314_v28, %v314_v28  ;;  %v1823_v32 = vor.u32 %v2452_v27, %v1822_v26  ;;  %v1814_v35 = vld [vmem:[#allocation8 + $0x30] sm:$0xf] }
  0x26   :  { %415 = vmatpush.bf16.msra.mxu0 %v1839_v12  ;;  %428 = vmatpush.bf16.msra.mxu1 %v1843_v13  ;;  %v2623_v33 = vld [vmem:[#allocation2] ss:$0 sm:$0xff]  ;;  %v1827_v34 = vor.u32 %v2451_v29, %v1824_v30  ;;  %v2450_v36 = vld [vmem:[#allocation8 + $0x34] sm:$0xf0]  ;;  %v2449_v37 = vld [vmem:[#allocation8 + $0x34] sm:$0xf] }
  0x27   :  { %461 = vmatpush.bf16.msra.mxu2 %v1855_v20  ;;  %474 = vmatpush.bf16.msra.mxu3 %v1859_v24  ;;  %v1816_v38 = vld [vmem:[#allocation8 + $0x38] sm:$0xf0]  ;;  %v2624_v39 = vld [vmem:[#allocation5] ss:$0 sm:$0xff]  ;;  %v1815_v41 = vor.u32 %v2450_v36, %v1814_v35  ;;  %v1806_v44 = vld [vmem:[#allocation8 + $0x20] sm:$0xf] }
  0x28   :  { %v1819_v43 = vor.u32 %v2449_v37, %v1816_v38  ;;  %v2448_v45 = vld [vmem:[#allocation8 + $0x24] sm:$0xf0]  ;;  %v2447_v46 = vld [vmem:[#allocation8 + $0x24] sm:$0xf]  ;;  %v1808_v47 = vld [vmem:[#allocation8 + $0x28] sm:$0xf0] }
  0x29   :  { %v1807_v49 = vor.u32 %v2448_v45, %v1806_v44  ;;  %v1811_v51 = vor.u32 %v2447_v46, %v1808_v47  ;;  %v1798_v52 = vld [vmem:[#allocation8 + $0x10] sm:$0xf]  ;;  %v2446_v53 = vld [vmem:[#allocation8 + $0x14] sm:$0xf0]  ;;  %v2445_v54 = vld [vmem:[#allocation8 + $0x14] sm:$0xf] }
  0x2a   :  { %416 = vmatpush.bf16.msra.mxu0 %v1831_v23  ;;  %1860 = vmatmul.msk.bf16.vlgmr.msra.gmra.mxu2 %vm450_vm0, %v315_v31  ;;  %v1800_v55 = vld [vmem:[#allocation8 + $0x18] sm:$0xf0]  ;;  %v1799_v57 = vor.u32 %v2446_v53, %v1798_v52  ;;  %v1790_v60 = vld [vmem:[#allocation8] sm:$0xf]  ;;  %v2444_v61 = vld [vmem:[#allocation8 + $0x4] sm:$0xf0] }
  0x2b   :  { %429 = vmatpush.bf16.msra.mxu1 %v1835_v25  ;;  %1861 = vmatmul.msk.bf16.vlgmr.msra.gmra.mxu3 %vm450_vm0, %v315_v31  ;;  %v1803_v59 = vor.u32 %v2445_v54, %v1800_v55  ;;  %v2443_v62 = vld [vmem:[#allocation8 + $0x4] sm:$0xf]  ;;  %v1792_v63 = vld [vmem:[#allocation8 + $0x8] sm:$0xf0]  ;;  %v1791_v3 = vor.u32 %v2444_v61, %v1790_v60  ;;  %v2862_v11 = vmov 683565275  }
  0x2c   :  { %v1795_v4 = vor.u32 %v2443_v62, %v1792_v63  ;;  %v2863_v13 = vmov 2475754826   ;;  %v2864_v16 = vmov 2131351028   ;;  %v2865_v19 = vmov 2102212464  }
  0x2d   :  { %v2866_v22 = vmov 920167782   ;;  %v2867_v25 = vmov 1326507024   ;;  %s2868_s7 = smov [#allocation14]   ;;  %s1772_s23 = sshll.u32 %s3060_s11, 4  ;;  %s1773_s23 = int_to_ptr.hbm [resolvable:$true] %s1772_s23 }
  0x2e   :  { %417 = vmatpush.bf16.msra.mxu0 %v1823_v32  ;;  %s1770_s20 = sshll.u32 %s2868_s7, 4  ;;  %s1771_s20 = int_to_ptr.vmem [resolvable:$true] %s1770_s20 }
  0x2f   :  { %430 = vmatpush.bf16.msra.mxu1 %v1827_v34 }
  0x32   :  { %418 = vmatpush.bf16.msra.mxu0 %v1815_v41 }
  0x33   :  { %431 = vmatpush.bf16.msra.mxu1 %v1819_v43 }
  0x36   :  { %419 = vmatpush.bf16.msra.mxu0 %v1807_v49 }
  0x37   :  { %432 = vmatpush.bf16.msra.mxu1 %v1811_v51 }
  0x3a   :  { %420 = vmatpush.bf16.msra.mxu0 %v1799_v57 }
  0x3b   :  { %433 = vmatpush.bf16.msra.mxu1 %v1803_v59 }
  0x3e   :  { %421 = vmatpush.bf16.msra.mxu0 %v1791_v3 }
  0x3f   :  { %434 = vmatpush.bf16.msra.mxu1 %v1795_v4 }
  0x92   :  { %v148_v40 = vpop.permute.xlu0 %147 }
  0x93   :  { %v153_v42 = vmul.f32 %v2623_v33, %v148_v40 }
  0x95   :  { %v2957_v48 = vadd.f32 %v2624_v39, %v153_v42 }
  0x97   :  { %v162_v50 = vand.u32 2139095040, %v2957_v48  ;;  %v159_v1 = vand.u32 2147483647, %v2957_v48  ;;  %vm161_vm13 = vcmp.lt.s32.totalorder %v2957_v48, 0 }
  0x99   :  { %v163_v56 = vshrl.u32 %v162_v50, 23  ;;  %v166_v6 = vand.u32 8388607, %v159_v1  ;;  %vm3015_vm14 = vcmp.le.f32.partialorder %v159_v1, 0.7853982 }
  0x9b   :  { %v1785_v58 = vadd.s32 4294967169, %v163_v56  ;;  %v167_v10 = vor.u32 8388608, %v166_v6 }
  0x9d   :  { %v169_v2 = vadd.s32 1, %v1785_v58  ;;  %v2974_v32 = vshll.u32 %v167_v10, 8 }
  0x9f   :  { %vm170_vm1 = vcmp.gt.s32.totalorder %v169_v2, 0  ;;  %v208_v41 = vand.u32 65535, %v2974_v32  ;;  %v209_v42 = vshrl.u32 %v2974_v32, 16 }
  0xa0   :  { %v171_v5 = vsel %vm170_vm1, %v169_v2, 0 }
  0xa1   :  { %v173_v7 = vand.u32 31, %v171_v5  ;;  %v2965_v9 = vshrl.u32 %v171_v5, 5 }
  0xa3   :  { %v2963_v8 = vsub.s32 32, %v173_v7  ;;  %v176_v12 = vshll.u32 %v2862_v11, %v173_v7  ;;  %v179_v14 = vshll.u32 %v2863_v13, %v173_v7  ;;  %v182_v18 = vshll.u32 %v2864_v16, %v173_v7 }
  0xa4   :  { %v185_v21 = vshll.u32 %v2865_v19, %v173_v7  ;;  %v188_v24 = vshll.u32 %v2866_v22, %v173_v7  ;;  %vm191_vm2 = vcmp.lt.s32.totalorder %v2965_v9, 1  ;;  %vm194_vm3 = vcmp.lt.s32.totalorder %v2965_v9, 4 }
  0xa5   :  { %v177_v15 = vshrl.u32 %v2863_v13, %v2963_v8  ;;  %v180_v17 = vshrl.u32 %v2864_v16, %v2963_v8  ;;  %v183_v20 = vshrl.u32 %v2865_v19, %v2963_v8  ;;  %v186_v23 = vshrl.u32 %v2866_v22, %v2963_v8 }
  0xa6   :  { %v189_v26 = vshrl.u32 %v2867_v25, %v2963_v8  ;;  %vm193_vm4 = vcmp.lt.s32.totalorder %v2965_v9, 3  ;;  %vm192_vm5 = vcmp.lt.s32.totalorder %v2965_v9, 2  ;;  %v175_v6 = vshrl.u32 %v2862_v11, %v2963_v8 }
  0xa7   :  { %v178_v27 = vor.u32 %v177_v15, %v176_v12  ;;  %v181_v28 = vor.u32 %v180_v17, %v179_v14  ;;  %v184_v29 = vor.u32 %v183_v20, %v182_v18  ;;  %v187_v30 = vor.u32 %v186_v23, %v185_v21 }
  0xa8   :  { %v190_v31 = vor.u32 %v189_v26, %v188_v24 }
  0xa9   :  { %v199_v33 = vsel %vm191_vm2, %v178_v27, %v181_v28  ;;  %v203_v34 = vsel %vm191_vm2, %v181_v28, %v184_v29  ;;  %v200_v35 = vsel %vm194_vm3, %v187_v30, 920167782  ;;  %v196_v3 = vsel %vm194_vm3, %v184_v29, 2102212464 }
  0xaa   :  { %v204_v36 = vsel %vm194_vm3, %v190_v31, 1326507024  ;;  %v201_v37 = vsel %vm193_vm4, %v184_v29, %v200_v35  ;;  %v195_v15 = vsel %vm191_vm2, %v175_v6, %v178_v27  ;;  %v197_v16 = vsel %vm193_vm4, %v181_v28, %v196_v3 }
  0xab   :  { %v205_v38 = vsel %vm193_vm4, %v187_v30, %v204_v36  ;;  %v202_v39 = vsel %vm192_vm5, %v199_v33, %v201_v37  ;;  %v198_v8 = vsel %vm192_vm5, %v195_v15, %v197_v16  ;;  %vm302_vm2 = vweird.f32 %v2957_v48 }
  0xac   :  { %v206_v40 = vsel %vm192_vm5, %v203_v34, %v205_v38  ;;  %v232_v45 = vand.u32 65535, %v202_v39  ;;  %v233_v46 = vshrl.u32 %v202_v39, 16  ;;  %v252_v23 = vmul.u32 %v2974_v32, %v198_v8 }
  0xad   :  { %v210_v43 = vand.u32 65535, %v206_v40  ;;  %v211_v44 = vshrl.u32 %v206_v40, 16  ;;  %v3025_v16 = vpop.f32.mrf.mxu2 }
  0xae   :  { %v235_v50 = vmul.u32 %v233_v46, %v208_v41  ;;  %v236_v51 = vmul.u32 %v232_v45, %v209_v42  ;;  %v234_v55 = vmul.u32 %v232_v45, %v208_v41  ;;  %v237_v59 = vmul.u32 %v233_v46, %v209_v42 }
  0xaf   :  { %v213_v47 = vmul.u32 %v211_v44, %v208_v41  ;;  %v214_v49 = vmul.u32 %v210_v43, %v209_v42  ;;  %v212_v52 = vmul.u32 %v210_v43, %v208_v41  ;;  %v215_v54 = vmul.u32 %v211_v44, %v209_v42 }
  0xb0   :  { %v238_v56 = vshll.u32 %v235_v50, 16  ;;  %v240_v61 = vshll.u32 %v236_v51, 16  ;;  %v239_v13 = vshrl.u32 %v235_v50, 16  ;;  %v241_v19 = vshrl.u32 %v236_v51, 16 }
  0xb1   :  { %v216_v53 = vshll.u32 %v213_v47, 16  ;;  %v218_v57 = vshll.u32 %v214_v49, 16  ;;  %v217_v7 = vshrl.u32 %v213_v47, 16  ;;  %v219_v17 = vshrl.u32 %v214_v49, 16  ;;  %v2485_v47 = vld [vmem:[#allocation11 + $0xd4] sm:$0xf] }
  0xb2   :  { %vm242_vm7 = vc.u32 %v234_v55, %v238_v56  ;;  %v244_v62 = vadd.s32 %v238_v56, %v234_v55 }
  0xb3   :  { %vm220_vm6 = vc.u32 %v212_v52, %v216_v53  ;;  %v222_v58 = vadd.s32 %v216_v53, %v212_v52  ;;  %v243_v2 = vsel %vm242_vm7, 1, %v2861_v0 }
  0xb4   :  { %v221_v60 = vsel %vm220_vm6, 1, %v2861_v0  ;;  %v245_v5 = vadd.s32 %v243_v2, %v237_v59  ;;  %vm246_vm9 = vc.u32 %v244_v62, %v240_v61  ;;  %v248_v22 = vadd.s32 %v244_v62, %v240_v61 }
  0xb5   :  { %v223_v63 = vadd.s32 %v221_v60, %v215_v54  ;;  %vm224_vm8 = vc.u32 %v222_v58, %v218_v57  ;;  %v247_v12 = vsel %vm246_vm9, 1, %v2861_v0 }
  0xb6   :  { %v225_v4 = vsel %vm224_vm8, 1, %v2861_v0  ;;  %v249_v14 = vadd.s32 %v247_v12, %v245_v5 }
  0xb7   :  { %v227_v10 = vadd.s32 %v225_v4, %v223_v63 }
  0xb8   :  { %v250_v20 = vadd.s32 %v249_v14, %v239_v13 }
  0xb9   :  { %v228_v18 = vadd.s32 %v227_v10, %v217_v7 }
  0xba   :  { %v251_v11 = vadd.s32 %v250_v20, %v241_v19  ;;  %v1920_v20 = vld [vmem:[#allocation11 + $0x70] sm:$0xf] }
  0xbb   :  { %v229_v21 = vadd.s32 %v228_v18, %v219_v17  ;;  %v3027_v17 = vpop.f32.mrf.mxu3  ;;  %v465_v18 = vpop.f32.mrf.mxu2 }
  0xbc   :  { %v255_v0 = vadd.s32 1, %v251_v11  ;;  %v2464_v18 = vld [vmem:[#allocation11 + $0x24] sm:$0xf0] }
  0xbd   :  { %vm254_vm10 = vc.u32 %v229_v21, %v248_v22  ;;  %v253_v9 = vadd.s32 %v248_v22, %v229_v21  ;;  %v2474_v21 = vld [vmem:[#allocation11 + $0x74] sm:$0xf0]  ;;  %v1984_v22 = vld [vmem:[#allocation11 + $0xf0] sm:$0xf] }
  0xbe   :  { %v256_v24 = vsel %vm254_vm10, %v255_v0, %v251_v11  ;;  %v1921_v8 = vor.u32 %v2474_v21, %v1920_v20  ;;  %v2490_v11 = vld [vmem:[#allocation11 + $0xf4] sm:$0xf0]  ;;  %v2473_v0 = vld [vmem:[#allocation11 + $0x74] sm:$0xf]  ;;  %v2480_v21 = vld [vmem:[#allocation11 + $0xa4] sm:$0xf0] }
  0xbf   :  { %v257_v25 = vadd.s32 %v256_v24, %v252_v23  ;;  %v1922_v23 = vld [vmem:[#allocation11 + $0x78] sm:$0xf0]  ;;  %v1985_v24 = vor.u32 %v2490_v11, %v1984_v22  ;;  %v2463_v22 = vld [vmem:[#allocation11 + $0x24] sm:$0xf] }
  0xc0   :  { %708 = vmatpush.bf16.msrb.mxu2 %v1921_v8  ;;  %v1882_v8 = vld [vmem:[#allocation11 + $0x28] sm:$0xf0]  ;;  %v2479_v11 = vld [vmem:[#allocation11 + $0xa4] sm:$0xf] }
  0xc1   :  { %v258_v26 = vadd.s32 536870912, %v257_v25  ;;  %721 = vmatpush.bf16.msrb.mxu3 %v1985_v24 }
  0xc3   :  { %v259_v27 = vshrl.u32 %v258_v26, 30  ;;  %v478_v19 = vpop.f32.mrf.mxu3  ;;  %v1986_v26 = vld [vmem:[#allocation11 + $0xf8] sm:$0xf0] }
  0xc4   :  { %v1944_v19 = vld [vmem:[#allocation11 + $0xa0] sm:$0xf] }
  0xc5   :  { %v260_v29 = vshll.u32 %v259_v27, 30  ;;  %v283_v54 = vsub.s32 4, %v259_v27  ;;  %v1945_v24 = vor.u32 %v2480_v21, %v1944_v19 }
  0xc7   :  { %v261_v28 = vsub.s32 %v257_v25, %v260_v29  ;;  %v284_v59 = vsel %vm161_vm13, %v283_v54, %v259_v27  ;;  %v2489_v25 = vld [vmem:[#allocation11 + $0xf4] sm:$0xf]  ;;  %v1912_v29 = vld [vmem:[#allocation11 + $0x60] sm:$0xf] }
  0xc8   :  { %v286_v1 = vsel %vm3015_vm14, 0, %v284_v59  ;;  %v1989_v27 = vor.u32 %v2489_v25, %v1986_v26  ;;  %v1960_v54 = vld [vmem:[#allocation11 + $0xc0] sm:$0xf]  ;;  %v2483_v59 = vld [vmem:[#allocation11 + $0xc4] sm:$0xf] }
  0xc9   :  { %vm262_vm11 = vcmp.lt.s32.totalorder %v261_v28, 0  ;;  %v263_v30 = vsub.s32 0, %v261_v28  ;;  %v303_v4 = vand.u32 3, %v286_v1  ;;  %v1872_v25 = vld [vmem:[#allocation11 + $0x10] sm:$0xf] }
  0xca   :  { %747 = vmatpush.bf16.msrb.mxu1 %v1989_v27  ;;  %v2462_v26 = vld [vmem:[#allocation11 + $0x14] sm:$0xf0]  ;;  %v1936_v27 = vld [vmem:[#allocation11 + $0x90] sm:$0xf] }
  0xcb   :  { %v264_v31 = vsel %vm262_vm11, %v263_v30, %v261_v28  ;;  %vm305_vm15 = vcmp.eq.s32.totalorder %v303_v4, 0  ;;  %vm308_vm0 = vcmp.eq.s32.totalorder %v303_v4, 2  ;;  %vm304_vm1 = vcmp.lt.s32.totalorder %v303_v4, 2  ;;  %v1976_v30 = vld [vmem:[#allocation11 + $0xe0] sm:$0xf] }
  0xcc   :  { %v265_v33 = vclz %v264_v31  ;;  %v2482_v4 = vld [vmem:[#allocation11 + $0xb4] sm:$0xf0] }
  0xce   :  { %v1786_v34 = vadd.s32 4294967294, %v265_v33  ;;  %v2488_v33 = vld [vmem:[#allocation11 + $0xe4] sm:$0xf0] }
  0xd0   :  { %vm1787_vm12 = vcmp.lt.s32.totalorder %v1786_v34, 0 }
  0xd1   :  { %v268_v35 = vsel %vm1787_vm12, 0, %v1786_v34  ;;  %v2471_v34 = vld [vmem:[#allocation11 + $0x64] sm:$0xf] }
  0xd2   :  { %v269_v36 = vsub.s32 32, %v268_v35  ;;  %v273_v37 = vsub.s32 4294967266, %v268_v35  ;;  %v270_v38 = vshll.u32 %v261_v28, %v268_v35  ;;  %v2472_v28 = vld [vmem:[#allocation11 + $0x64] sm:$0xf0]  ;;  %v1914_v35 = vld [vmem:[#allocation11 + $0x68] sm:$0xf0] }
  0xd3   :  { %v1913_v31 = vor.u32 %v2472_v28, %v1912_v29  ;;  %v2478_v28 = vld [vmem:[#allocation11 + $0x94] sm:$0xf0] }
  0xd4   :  { %v271_v39 = vshrl.u32 %v253_v9, %v269_v36  ;;  %v274_v40 = vadd.s32 127, %v273_v37  ;;  %v1977_v9 = vor.u32 %v2488_v33, %v1976_v30  ;;  %v1917_v36 = vor.u32 %v2471_v34, %v1914_v35  ;;  %v2487_v37 = vld [vmem:[#allocation11 + $0xe4] sm:$0xf]  ;;  %v2461_v30 = vld [vmem:[#allocation11 + $0x14] sm:$0xf] }
  0xd5   :  { %709 = vmatpush.bf16.msrb.mxu2 %v1913_v31  ;;  %v1874_v31 = vld [vmem:[#allocation11 + $0x18] sm:$0xf0]  ;;  %v2477_v33 = vld [vmem:[#allocation11 + $0x94] sm:$0xf] }
  0xd6   :  { %v272_v32 = vor.u32 %v271_v39, %v270_v38  ;;  %v275_v41 = vshll.u32 %v274_v40, 23  ;;  %v1978_v38 = vld [vmem:[#allocation11 + $0xe8] sm:$0xf0]  ;;  %v1904_v39 = vld [vmem:[#allocation11 + $0x50] sm:$0xf]  ;;  %722 = vmatpush.bf16.msrb.mxu3 %v1977_v9  ;;  %v1873_v9 = vor.u32 %v2462_v26, %v1872_v25 }
  0xd7   :  { %v1981_v40 = vor.u32 %v2487_v37, %v1978_v38  ;;  %v1938_v34 = vld [vmem:[#allocation11 + $0x98] sm:$0xf0]  ;;  %v1877_v37 = vor.u32 %v2461_v30, %v1874_v31  ;;  %v1864_v38 = vld [vmem:[#allocation11] sm:$0xf] }
  0xd8   :  { %v276_v42 = vor.u32 4788187, %v275_v41  ;;  %v279_v44 = vcvt.s32.f32 %v272_v32  ;;  %v2470_v32 = vld [vmem:[#allocation11 + $0x54] sm:$0xf0]  ;;  %v1968_v41 = vld [vmem:[#allocation11 + $0xd0] sm:$0xf] }
  0xd9   :  { %748 = vmatpush.bf16.msrb.mxu1 %v1981_v40  ;;  %v480_v35 = vld [vmem:[#allocation10] sm:$0x3]  ;;  %v1928_v40 = vld [vmem:[#allocation11 + $0x80] sm:$0xf] }
  0xda   :  { %v277_v43 = vand.u32 2147483647, %v276_v42  ;;  %v2486_v42 = vld [vmem:[#allocation11 + $0xd4] sm:$0xf0]  ;;  %v2051_v25 = vld [vmem:[#allocation11 + $0x178] sm:$0xf0] }
  0xdb   :  { %v2041_v31 = vld [vmem:[#allocation11 + $0x160] sm:$0xf] }
  0xdc   :  { %v280_v45 = vmul.f32 %v279_v44, %v277_v43  ;;  %v1905_v43 = vor.u32 %v2470_v32, %v1904_v39  ;;  %v1969_v44 = vor.u32 %v2486_v42, %v1968_v41  ;;  %v2460_v39 = vld [vmem:[#allocation11 + $0x4] sm:$0xf0]  ;;  %v1941_v32 = vor.u32 %v2477_v33, %v1938_v34  ;;  %v2459_v42 = vld [vmem:[#allocation11 + $0x4] sm:$0xf]  ;;  %v2105_v34 = vld [vmem:[#allocation11 + $0x1e0] sm:$0xf] }
  0xdd   :  { %v2476_v41 = vld [vmem:[#allocation11 + $0x84] sm:$0xf0] }
  0xde   :  { %v281_v46 = vxor.u32 2147483648, %v280_v45  ;;  %710 = vmatpush.bf16.msrb.mxu2 %v1905_v43  ;;  %723 = vmatpush.bf16.msrb.mxu3 %v1969_v44  ;;  %v1866_v43 = vld [vmem:[#allocation11 + $0x8] sm:$0xf0]  ;;  %v2475_v44 = vld [vmem:[#allocation11 + $0x84] sm:$0xf] }
  0xdf   :  { %v2504_v33 = vld [vmem:[#allocation11 + $0x164] sm:$0xf0] }
  0xe0   :  { %v282_v49 = vsel %vm161_vm13, %v281_v46, %v280_v45  ;;  %v2469_v45 = vld [vmem:[#allocation11 + $0x54] sm:$0xf]  ;;  %v1906_v46 = vld [vmem:[#allocation11 + $0x58] sm:$0xf0] }
  0xe1   :  { %v285_v50 = vsel %vm3015_vm14, %v2957_v48, %v282_v49  ;;  %v1925_v48 = vor.u32 %v2473_v0, %v1922_v23  ;;  %v1909_v49 = vor.u32 %v2469_v45, %v1906_v46  ;;  %v1946_v0 = vld [vmem:[#allocation11 + $0xa8] sm:$0xf0]  ;;  %v1865_v46 = vor.u32 %v2460_v39, %v1864_v38 }
  0xe2   :  { %v287_v51 = vmul.f32 %v285_v50, %v285_v50  ;;  %v1949_v29 = vor.u32 %v2479_v11, %v1946_v0  ;;  %v1930_v45 = vld [vmem:[#allocation11 + $0x88] sm:$0xf0]  ;;  %v2506_v11 = vld [vmem:[#allocation11 + $0x174] sm:$0xf0]  ;;  %v2113_v0 = vld [vmem:[#allocation11 + $0x1f0] sm:$0xf] }
  0xe3   :  { %734 = vmatpush.bf16.msrb.mxu0 %v1925_v48  ;;  %v1885_v48 = vor.u32 %v2463_v22, %v1882_v8  ;;  %v2049_v8 = vld [vmem:[#allocation11 + $0x170] sm:$0xf] }
  0xe4   :  { %v288_v52 = vmul.f32 -0.001358992, %v287_v51  ;;  %v295_v53 = vmul.f32 -0.00019511016, %v287_v51 }
  0xe6   :  { %v289_v55 = vadd.f32 0.041655596, %v288_v52  ;;  %v296_v56 = vadd.f32 0.008332121, %v295_v53  ;;  %v2468_v52 = vld [vmem:[#allocation11 + $0x44] sm:$0xf0] }
  0xe7   :  { %735 = vmatpush.bf16.msrb.mxu0 %v1917_v36  ;;  %v1937_v36 = vor.u32 %v2478_v28, %v1936_v27  ;;  %v2115_v28 = vld [vmem:[#allocation11 + $0x1f8] sm:$0xf0] }
  0xe8   :  { %v290_v57 = vmul.f32 %v289_v55, %v287_v51  ;;  %v297_v58 = vmul.f32 %v296_v56, %v287_v51  ;;  %v2484_v55 = vld [vmem:[#allocation11 + $0xc4] sm:$0xf0]  ;;  %v2467_v56 = vld [vmem:[#allocation11 + $0x44] sm:$0xf] }
  0xea   :  { %v291_v60 = vadd.f32 -0.4999988, %v290_v57  ;;  %v298_v61 = vadd.f32 -0.16666654, %v297_v58  ;;  %v1898_v58 = vld [vmem:[#allocation11 + $0x48] sm:$0xf0] }
  0xeb   :  { %736 = vmatpush.bf16.msrb.mxu0 %v1909_v49  ;;  %v1901_v1 = vor.u32 %v2467_v56, %v1898_v58  ;;  %v483_v49 = vperm.slane %v480_v35, 1 }
  0xec   :  { %v292_v62 = vmul.f32 %v291_v60, %v287_v51  ;;  %v299_v63 = vmul.f32 %v298_v61, %v287_v51  ;;  %v1896_v51 = vld [vmem:[#allocation11 + $0x40] sm:$0xf]  ;;  %v1962_v60 = vld [vmem:[#allocation11 + $0xc8] sm:$0xf0]  ;;  %v1961_v61 = vor.u32 %v2484_v55, %v1960_v54  ;;  %v1933_v54 = vor.u32 %v2475_v44, %v1930_v45  ;;  %v2097_v44 = vld [vmem:[#allocation11 + $0x1d0] sm:$0xf] }
  0xed   :  { %v1897_v57 = vor.u32 %v2468_v52, %v1896_v51  ;;  %v1869_v51 = vor.u32 %v2459_v42, %v1866_v43  ;;  %v2033_v42 = vld [vmem:[#allocation11 + $0x150] sm:$0xf]  ;;  %v2502_v43 = vld [vmem:[#allocation11 + $0x154] sm:$0xf0] }
  0xee   :  { %v293_v2 = vadd.f32 1.0, %v292_v62  ;;  %v300_v3 = vadd.f32 1.0, %v299_v63  ;;  %v1888_v62 = vld [vmem:[#allocation11 + $0x30] sm:$0xf]  ;;  %v2466_v63 = vld [vmem:[#allocation11 + $0x34] sm:$0xf0]  ;;  %724 = vmatpush.bf16.msrb.mxu3 %v1961_v61  ;;  %v2034_v45 = vor.u32 %v2502_v43, %v2033_v42 }
  0xef   :  { %711 = vmatpush.bf16.msrb.mxu2 %v1897_v57  ;;  %737 = vmatpush.bf16.msrb.mxu0 %v1901_v1  ;;  %v2492_v42 = vld [vmem:[#allocation11 + $0x104] sm:$0xf0]  ;;  %v2057_v43 = vld [vmem:[#allocation11 + $0x180] sm:$0xf] }
  0xf0   :  { %v301_v5 = vmul.f32 %v300_v3, %v285_v50  ;;  %v309_v6 = vxor.u32 2147483648, %v293_v2  ;;  %v1970_v50 = vld [vmem:[#allocation11 + $0xd8] sm:$0xf0]  ;;  %v1965_v3 = vor.u32 %v2483_v59, %v1962_v60 }
  0xf1   :  { %v1973_v53 = vor.u32 %v2485_v47, %v1970_v50  ;;  %v482_v47 = vperm.slane %v480_v35, 0  ;;  %v1929_v50 = vor.u32 %v2476_v41, %v1928_v40  ;;  %v2042_v35 = vor.u32 %v2504_v33, %v2041_v31  ;;  %v2519_v40 = vld [vmem:[#allocation11 + $0x1e4] sm:$0xf]  ;;  %v2510_v31 = vld [vmem:[#allocation11 + $0x194] sm:$0xf0] }
  0xf2   :  { %v306_v7 = vxor.u32 2147483648, %v301_v5  ;;  %v310_v12 = vsel %vm308_vm0, %v309_v6, %v301_v5  ;;  %v2465_v5 = vld [vmem:[#allocation11 + $0x34] sm:$0xf]  ;;  %v1890_v6 = vld [vmem:[#allocation11 + $0x38] sm:$0xf0] }
  0xf3   :  { %749 = vmatpush.bf16.msrb.mxu1 %v1973_v53  ;;  %v2493_v33 = vld [vmem:[#allocation11 + $0x114] sm:$0xf] }
  0xf4   :  { %v307_v10 = vsel %vm305_vm15, %v293_v2, %v306_v7  ;;  %v1952_v2 = vld [vmem:[#allocation11 + $0xb0] sm:$0xf]  ;;  %v2481_v7 = vld [vmem:[#allocation11 + $0xb4] sm:$0xf] }
  0xf5   :  { %v311_v13 = vsel %vm304_vm1, %v307_v10, %v310_v12  ;;  %v1954_v10 = vld [vmem:[#allocation11 + $0xb8] sm:$0xf0]  ;;  %v1889_v12 = vor.u32 %v2466_v63, %v1888_v62 }
  0xf6   :  { %v312_v14 = vsel %vm302_vm2, nan, %v311_v13  ;;  %v1953_v13 = vor.u32 %v2482_v4, %v1952_v2  ;;  %v1957_v20 = vor.u32 %v2481_v7, %v1954_v10 }
  0xf7   :  { %v313_v15 = vpack.c.bf16 %v312_v14, %v312_v14  ;;  %v1893_v14 = vor.u32 %v2465_v5, %v1890_v6  ;;  %750 = vmatpush.bf16.msrb.mxu1 %v1965_v3  ;;  %712 = vmatpush.bf16.msrb.mxu2 %v1889_v12 }
  0xf8   :  { %725 = vmatpush.bf16.msrb.mxu3 %v1953_v13 }
  0xf9   :  { %422 = vmatmul.bf16.vlgmr.msra.gmra.mxu0 %v313_v15  ;;  %435 = vmatmul.bf16.vlgmr.msra.gmra.mxu1 %v313_v15  ;;  %v1880_v15 = vld [vmem:[#allocation11 + $0x20] sm:$0xf] }
  0xfa   :  { %v1881_v23 = vor.u32 %v2464_v18, %v1880_v15  ;;  %738 = vmatpush.bf16.msrb.mxu0 %v1893_v14 }
  0xfb   :  { %751 = vmatpush.bf16.msrb.mxu1 %v1957_v20 }
  0xfc   :  { %713 = vmatpush.bf16.msrb.mxu2 %v1881_v23  ;;  %726 = vmatpush.bf16.msrb.mxu3 %v1945_v24  ;;  %v2050_v23 = vor.u32 %v2506_v11, %v2049_v8  ;;  %v2522_v24 = vld [vmem:[#allocation11 + $0x1f4] sm:$0xf0]  ;;  %v2512_v8 = vld [vmem:[#allocation11 + $0x1a4] sm:$0xf0]  ;;  %v2495_v11 = vld [vmem:[#allocation11 + $0x124] sm:$0xf] }
  0xfd   :  { %v2114_v26 = vor.u32 %v2522_v24, %v2113_v0  ;;  %v2511_v24 = vld [vmem:[#allocation11 + $0x1a4] sm:$0xf] }
  0xfe   :  { %739 = vmatpush.bf16.msrb.mxu0 %v1885_v48  ;;  %v2505_v48 = vld [vmem:[#allocation11 + $0x174] sm:$0xf] }
  0xff   :  { %752 = vmatpush.bf16.msrb.mxu1 %v1949_v29  ;;  %v2054_v27 = vor.u32 %v2505_v48, %v2051_v25  ;;  %v2521_v29 = vld [vmem:[#allocation11 + $0x1f4] sm:$0xf]  ;;  %v2075_v48 = vld [vmem:[#allocation11 + $0x1a8] sm:$0xf0] }
 0x100   :  { %714 = vmatpush.bf16.msrb.mxu2 %v1873_v9  ;;  %727 = vmatpush.bf16.msrb.mxu3 %v1937_v36  ;;  %v2118_v30 = vor.u32 %v2521_v29, %v2115_v28  ;;  %v2520_v9 = vld [vmem:[#allocation11 + $0x1e4] sm:$0xf0]  ;;  %v2503_v36 = vld [vmem:[#allocation11 + $0x164] sm:$0xf]  ;;  %v2494_v29 = vld [vmem:[#allocation11 + $0x114] sm:$0xf0] }
 0x101   :  { %v2106_v38 = vor.u32 %v2520_v9, %v2105_v34  ;;  %v2065_v28 = vld [vmem:[#allocation11 + $0x190] sm:$0xf]  ;;  %v2003_v34 = vld [vmem:[#allocation11 + $0x118] sm:$0xf0] }
 0x102   :  { %740 = vmatpush.bf16.msrb.mxu0 %v1877_v37  ;;  %v2043_v37 = vld [vmem:[#allocation11 + $0x168] sm:$0xf0]  ;;  %v2067_v9 = vld [vmem:[#allocation11 + $0x198] sm:$0xf0] }
 0x103   :  { %753 = vmatpush.bf16.msrb.mxu1 %v1941_v32  ;;  %v2046_v39 = vor.u32 %v2503_v36, %v2043_v37  ;;  %v2107_v32 = vld [vmem:[#allocation11 + $0x1e8] sm:$0xf0] }
 0x104   :  { %715 = vmatpush.bf16.msrb.mxu2 %v1865_v46  ;;  %728 = vmatpush.bf16.msrb.mxu3 %v1929_v50  ;;  %v2110_v41 = vor.u32 %v2519_v40, %v2107_v32  ;;  %v2518_v46 = vld [vmem:[#allocation11 + $0x1d4] sm:$0xf0]  ;;  %v2066_v40 = vor.u32 %v2510_v31, %v2065_v28  ;;  %v2006_v32 = vor.u32 %v2493_v33, %v2003_v34  ;;  %v2537_v28 = vld [vmem:[#allocation11 + $0x274] sm:$0xf] }
 0x105   :  { %v2098_v50 = vor.u32 %v2518_v46, %v2097_v44  ;;  %v2491_v46 = vld [vmem:[#allocation11 + $0x104] sm:$0xf]  ;;  %v2553_v34 = vld [vmem:[#allocation11 + $0x2f4] sm:$0xf] }
 0x106   :  { %741 = vmatpush.bf16.msrb.mxu0 %v1869_v51 }
 0x107   :  { %754 = vmatpush.bf16.msrb.mxu1 %v1933_v54 }
 0x108   :  { %982 = vmatpush.bf16.msra.mxu2 %v2050_v23  ;;  %995 = vmatpush.bf16.msra.mxu3 %v2114_v26  ;;  %v2011_v23 = vld [vmem:[#allocation11 + $0x128] sm:$0xf0] }
 0x109   :  { %v2014_v26 = vor.u32 %v2495_v11, %v2011_v23 }
 0x10a   :  { %1008 = vmatpush.bf16.msra.mxu0 %v2054_v27  ;;  %v2001_v27 = vld [vmem:[#allocation11 + $0x110] sm:$0xf] }
 0x10b   :  { %1021 = vmatpush.bf16.msra.mxu1 %v2118_v30  ;;  %v2078_v30 = vor.u32 %v2511_v24, %v2075_v48  ;;  %v2002_v37 = vor.u32 %v2494_v29, %v2001_v27  ;;  %v2178_v48 = vld [vmem:[#allocation11 + $0x270] sm:$0xf]  ;;  %v2554_v29 = vld [vmem:[#allocation11 + $0x2f4] sm:$0xf0] }
 0x10c   :  { %983 = vmatpush.bf16.msra.mxu2 %v2042_v35  ;;  %996 = vmatpush.bf16.msra.mxu3 %v2106_v38  ;;  %v2509_v35 = vld [vmem:[#allocation11 + $0x194] sm:$0xf] }
 0x10d   :  { %v2070_v44 = vor.u32 %v2509_v35, %v2067_v9  ;;  %v2244_v35 = vld [vmem:[#allocation11 + $0x2f8] sm:$0xf0] }
 0x10e   :  { %1009 = vmatpush.bf16.msra.mxu0 %v2046_v39  ;;  %v2247_v9 = vor.u32 %v2553_v34, %v2244_v35  ;;  %v2526_v34 = vld [vmem:[#allocation11 + $0x214] sm:$0xf0]  ;;  %v2194_v35 = vld [vmem:[#allocation11 + $0x290] sm:$0xf] }
 0x10f   :  { %1022 = vmatpush.bf16.msra.mxu1 %v2110_v41  ;;  %v1993_v41 = vld [vmem:[#allocation11 + $0x100] sm:$0xf] }
 0x110   :  { %984 = vmatpush.bf16.msra.mxu2 %v2034_v45  ;;  %997 = vmatpush.bf16.msra.mxu3 %v2098_v50  ;;  %v2508_v45 = vld [vmem:[#allocation11 + $0x184] sm:$0xf0]  ;;  %v2507_v50 = vld [vmem:[#allocation11 + $0x184] sm:$0xf] }
 0x176   :  { %v423_v52 = vpop.f32.mrf.mxu0  ;;  %v436_v53 = vpop.f32.mrf.mxu1 }
 0x177   :  { %v464_v55 = vadd.f32 %v3025_v16, %v423_v52  ;;  %v477_v56 = vadd.f32 %v3027_v17, %v436_v53  ;;  %v2517_v52 = vld [vmem:[#allocation11 + $0x1d4] sm:$0xf]  ;;  %v2099_v53 = vld [vmem:[#allocation11 + $0x1d8] sm:$0xf0] }
 0x178   :  { %v2102_v54 = vor.u32 %v2517_v52, %v2099_v53  ;;  %v1994_v52 = vor.u32 %v2492_v42, %v1993_v41  ;;  %v2172_v41 = vld [vmem:[#allocation11 + $0x268] sm:$0xf0] }
 0x179   :  { %v486_v57 = vadd.f32 %v482_v47, %v464_v55  ;;  %v487_v58 = vadd.f32 %v483_v49, %v477_v56  ;;  %v2501_v47 = vld [vmem:[#allocation11 + $0x154] sm:$0xf]  ;;  %v2035_v49 = vld [vmem:[#allocation11 + $0x158] sm:$0xf0]  ;;  %v2025_v55 = vld [vmem:[#allocation11 + $0x140] sm:$0xf] }
 0x17a   :  { %v2038_v51 = vor.u32 %v2501_v47, %v2035_v49  ;;  %v2500_v56 = vld [vmem:[#allocation11 + $0x144] sm:$0xf0]  ;;  %1023 = vmatpush.bf16.msra.mxu1 %v2102_v54  ;;  %v1995_v47 = vld [vmem:[#allocation11 + $0x108] sm:$0xf0]  ;;  %v2058_v54 = vor.u32 %v2508_v45, %v2057_v43 }
 0x17b   :  { %v488_v59 = vpack.c.bf16 %v487_v58, %v486_v57  ;;  %v2089_v57 = vld [vmem:[#allocation11 + $0x1c0] sm:$0xf]  ;;  %v2026_v58 = vor.u32 %v2500_v56, %v2025_v55  ;;  %v1998_v55 = vor.u32 %v2491_v46, %v1995_v47  ;;  %v2236_v45 = vld [vmem:[#allocation11 + $0x2e8] sm:$0xf0]  ;;  %v2162_v47 = vld [vmem:[#allocation11 + $0x250] sm:$0xf] }
 0x17c   :  { %1010 = vmatpush.bf16.msra.mxu0 %v2038_v51  ;;  %v2059_v51 = vld [vmem:[#allocation11 + $0x188] sm:$0xf0] }
 0x17d   :  { %v489_v60 = vunpack.c.l.bf16 %v488_v59  ;;  %v490_v61 = vunpack.c.h.bf16 %v488_v59  ;;  %v2516_v59 = vld [vmem:[#allocation11 + $0x1c4] sm:$0xf0]  ;;  %985 = vmatpush.bf16.msra.mxu2 %v2026_v58  ;;  %v2062_v58 = vor.u32 %v2507_v50, %v2059_v51  ;;  %v2226_v50 = vld [vmem:[#allocation11 + $0x2d0] sm:$0xf] }
 0x17e   :  { %v425_v1 = vpop.f32.mrf.mxu0  ;;  %v438_v62 = vpop.f32.mrf.mxu1 }
 0x17f   :  { %v491_v63 = vmul.f32 0.5, %v489_v60  ;;  %v492_v2 = vmul.f32 0.5, %v490_v61  ;;  %v2499_v60 = vld [vmem:[#allocation11 + $0x144] sm:$0xf]  ;;  %v2027_v61 = vld [vmem:[#allocation11 + $0x148] sm:$0xf0]  ;;  %v2090_v1 = vor.u32 %v2516_v59, %v2089_v57 }
 0x180   :  { %v2030_v62 = vor.u32 %v2499_v60, %v2027_v61 }
 0x181   :  { %v493_v3 = vpack.c.bf16 %v492_v2, %v491_v63  ;;  %v2515_v63 = vld [vmem:[#allocation11 + $0x1c4] sm:$0xf]  ;;  %v2091_v2 = vld [vmem:[#allocation11 + $0x1c8] sm:$0xf0]  ;;  %998 = vmatpush.bf16.msra.mxu3 %v2090_v1 }
 0x182   :  { %1011 = vmatpush.bf16.msra.mxu0 %v2030_v62 }
 0x183   :  { %v494_v4 = vunpack.c.l.bf16 %v493_v3  ;;  %v495_v5 = vunpack.c.h.bf16 %v493_v3  ;;  %v2017_v3 = vld [vmem:[#allocation11 + $0x130] sm:$0xf] }
 0x185   :  { %2626 = vtanh.f32 %v494_v4 }
 0x186   :  { %2628 = vtanh.f32 %v495_v5 }
 0x18b   :  { %v2627_v16 = vpop.eup %2626 }
 0x18c   :  { %v2629_v17 = vpop.eup %2628 }
 0x18d   :  { %v498_v6 = vpack.c.bf16 %v2629_v17, %v2627_v16  ;;  %v2081_v16 = vld [vmem:[#allocation11 + $0x1b0] sm:$0xf]  ;;  %v2514_v17 = vld [vmem:[#allocation11 + $0x1b4] sm:$0xf0] }
 0x18f   :  { %v499_v7 = vunpack.c.l.bf16 %v498_v6  ;;  %v500_v10 = vunpack.c.h.bf16 %v498_v6 }
 0x191   :  { %v501_v12 = vadd.f32 1.0, %v499_v7  ;;  %v502_v13 = vadd.f32 1.0, %v500_v10  ;;  %v2082_v7 = vor.u32 %v2514_v17, %v2081_v16  ;;  %v2497_v10 = vld [vmem:[#allocation11 + $0x134] sm:$0xf] }
 0x193   :  { %v503_v14 = vpack.c.bf16 %v502_v13, %v501_v12  ;;  %v2019_v12 = vld [vmem:[#allocation11 + $0x138] sm:$0xf0]  ;;  %v2513_v13 = vld [vmem:[#allocation11 + $0x1b4] sm:$0xf]  ;;  %999 = vmatpush.bf16.msra.mxu3 %v2082_v7 }
 0x195   :  { %v504_v15 = vunpack.c.l.bf16 %v503_v14  ;;  %v505_v18 = vunpack.c.h.bf16 %v503_v14  ;;  %v2022_v14 = vor.u32 %v2497_v10, %v2019_v12 }
 0x197   :  { %v506_v19 = vmul.f32 %v504_v15, %v494_v4  ;;  %v507_v20 = vmul.f32 %v505_v18, %v495_v5  ;;  %v2094_v4 = vor.u32 %v2515_v63, %v2091_v2  ;;  %v2498_v5 = vld [vmem:[#allocation11 + $0x134] sm:$0xf0]  ;;  %v2083_v15 = vld [vmem:[#allocation11 + $0x1b8] sm:$0xf0]  ;;  %v2009_v18 = vld [vmem:[#allocation11 + $0x120] sm:$0xf]  ;;  %1012 = vmatpush.bf16.msra.mxu0 %v2022_v14 }
 0x198   :  { %v2018_v6 = vor.u32 %v2498_v5, %v2017_v3 }
 0x199   :  { %v508_v21 = vpack.c.bf16 %v506_v19, %v506_v19  ;;  %v509_v22 = vpack.c.bf16 %v507_v20, %v507_v20  ;;  %1024 = vmatpush.bf16.msra.mxu1 %v2094_v4  ;;  %v2496_v19 = vld [vmem:[#allocation11 + $0x124] sm:$0xf0] }
 0x19a   :  { %v542_v20 = vld [vmem:[%s3057_s8] sm:$0x3]  ;;  %986 = vmatpush.bf16.msra.mxu2 %v2018_v6  ;;  %v2010_v0 = vor.u32 %v2496_v19, %v2009_v18 }
 0x19b   :  { %716 = vmatmul.bf16.vlgmr.msrb.gmra.mxu2 %v508_v21  ;;  %729 = vmatmul.bf16.vlgmr.msrb.gmra.mxu3 %v509_v22  ;;  %v545_v36 = vperm.slane %v542_v20, 1  ;;  %v544_v49 = vperm.slane %v542_v20, 0 }
 0x19c   :  { %742 = vmatmul.bf16.vlgmr.msrb.gmra.mxu0 %v508_v21  ;;  %755 = vmatmul.bf16.vlgmr.msrb.gmra.mxu1 %v509_v22  ;;  %v2086_v21 = vor.u32 %v2513_v13, %v2083_v15  ;;  %v2073_v22 = vld [vmem:[#allocation11 + $0x1a0] sm:$0xf] }
 0x19d   :  { %v2074_v25 = vor.u32 %v2512_v8, %v2073_v22  ;;  %1013 = vmatpush.bf16.msra.mxu0 %v2014_v26  ;;  %v2242_v26 = vld [vmem:[#allocation11 + $0x2f0] sm:$0xf] }
 0x19e   :  { %1025 = vmatpush.bf16.msra.mxu1 %v2086_v21  ;;  %987 = vmatpush.bf16.msra.mxu2 %v2010_v0  ;;  %v2243_v31 = vor.u32 %v2554_v29, %v2242_v26  ;;  %v2543_v29 = vld [vmem:[#allocation11 + $0x2a4] sm:$0xf] }
 0x19f   :  { %1000 = vmatpush.bf16.msra.mxu3 %v2074_v25  ;;  %v2538_v25 = vld [vmem:[#allocation11 + $0x274] sm:$0xf0] }
 0x1a0   :  { %v2179_v27 = vor.u32 %v2538_v25, %v2178_v48  ;;  %v2544_v48 = vld [vmem:[#allocation11 + $0x2a4] sm:$0xf0]  ;;  %v2527_v25 = vld [vmem:[#allocation11 + $0x224] sm:$0xf] }
 0x1a1   :  { %1014 = vmatpush.bf16.msra.mxu0 %v2006_v32  ;;  %v2535_v32 = vld [vmem:[#allocation11 + $0x264] sm:$0xf] }
 0x1a2   :  { %1026 = vmatpush.bf16.msra.mxu1 %v2078_v30  ;;  %988 = vmatpush.bf16.msra.mxu2 %v2002_v37  ;;  %v2180_v30 = vld [vmem:[#allocation11 + $0x278] sm:$0xf0]  ;;  %v2536_v37 = vld [vmem:[#allocation11 + $0x264] sm:$0xf0]  ;;  %v2175_v43 = vor.u32 %v2535_v32, %v2172_v41 }
 0x1a3   :  { %1001 = vmatpush.bf16.msra.mxu3 %v2066_v40  ;;  %v2183_v33 = vor.u32 %v2537_v28, %v2180_v30  ;;  %v2552_v40 = vld [vmem:[#allocation11 + $0x2e4] sm:$0xf0]  ;;  %v2204_v28 = vld [vmem:[#allocation11 + $0x2a8] sm:$0xf0] }
 0x1a5   :  { %1015 = vmatpush.bf16.msra.mxu0 %v1998_v55 }
 0x1a6   :  { %1027 = vmatpush.bf16.msra.mxu1 %v2070_v44  ;;  %989 = vmatpush.bf16.msra.mxu2 %v1994_v52  ;;  %v2551_v44 = vld [vmem:[#allocation11 + $0x2e4] sm:$0xf]  ;;  %v2550_v52 = vld [vmem:[#allocation11 + $0x2d4] sm:$0xf0] }
 0x1a7   :  { %1002 = vmatpush.bf16.msra.mxu3 %v2058_v54  ;;  %v2239_v46 = vor.u32 %v2551_v44, %v2236_v45  ;;  %v2164_v54 = vld [vmem:[#allocation11 + $0x258] sm:$0xf0]  ;;  %v2227_v55 = vor.u32 %v2550_v52, %v2226_v50  ;;  %v2523_v52 = vld [vmem:[#allocation11 + $0x204] sm:$0xf] }
 0x1a9   :  { %1282 = vmatpush.bf16.msrb.mxu0 %v2183_v33  ;;  %v2130_v33 = vld [vmem:[#allocation11 + $0x210] sm:$0xf] }
 0x1aa   :  { %1028 = vmatpush.bf16.msra.mxu1 %v2062_v58  ;;  %1256 = vmatpush.bf16.msrb.mxu2 %v2179_v27  ;;  %v2228_v58 = vld [vmem:[#allocation11 + $0x2d8] sm:$0xf0]  ;;  %v2140_v27 = vld [vmem:[#allocation11 + $0x228] sm:$0xf0]  ;;  %v2131_v41 = vor.u32 %v2526_v34, %v2130_v33  ;;  %v2586_v34 = vld [vmem:[#allocation11 + $0x3f4] sm:$0xf0] }
 0x1ab   :  { %1269 = vmatpush.bf16.msrb.mxu3 %v2243_v31  ;;  %v2143_v31 = vor.u32 %v2527_v25, %v2140_v27 }
 0x1ad   :  { %1283 = vmatpush.bf16.msrb.mxu0 %v2175_v43 }
 0x1ae   :  { %1295 = vmatpush.bf16.msrb.mxu1 %v2247_v9  ;;  %v2207_v9 = vor.u32 %v2543_v29, %v2204_v28  ;;  %v2307_v28 = vld [vmem:[#allocation11 + $0x370] sm:$0xf] }
 0x1b2   :  { %1296 = vmatpush.bf16.msrb.mxu1 %v2239_v46  ;;  %v2122_v46 = vld [vmem:[#allocation11 + $0x200] sm:$0xf] }
 0x219   :  { %v743_v38 = vpop.f32.mrf.mxu0  ;;  %v756_v39 = vpop.f32.mrf.mxu1 }
 0x21a   :  { %v744_v53 = vadd.f32 %v743_v38, %v545_v36  ;;  %v2170_v36 = vld [vmem:[#allocation11 + $0x260] sm:$0xf] }
 0x21b   :  { %v2234_v38 = vld [vmem:[#allocation11 + $0x2e0] sm:$0xf] }
 0x21c   :  { %v757_v60 = vadd.f32 %v756_v39, %v744_v53  ;;  %v2171_v39 = vor.u32 %v2536_v37, %v2170_v36  ;;  %v2235_v42 = vor.u32 %v2552_v40, %v2234_v38  ;;  %v2533_v53 = vld [vmem:[#allocation11 + $0x254] sm:$0xf]  ;;  %v2542_v36 = vld [vmem:[#allocation11 + $0x294] sm:$0xf0]  ;;  %v2132_v38 = vld [vmem:[#allocation11 + $0x218] sm:$0xf0] }
 0x21d   :  { %v2525_v37 = vld [vmem:[#allocation11 + $0x214] sm:$0xf]  ;;  %v2196_v40 = vld [vmem:[#allocation11 + $0x298] sm:$0xf0]  ;;  %v2195_v44 = vor.u32 %v2542_v36, %v2194_v35 }
 0x21e   :  { %v717_v56 = vpop.f32.mrf.mxu2  ;;  %v730_v57 = vpop.f32.mrf.mxu3  ;;  %1257 = vmatpush.bf16.msrb.mxu2 %v2171_v39  ;;  %1270 = vmatpush.bf16.msrb.mxu3 %v2235_v42  ;;  %v2541_v39 = vld [vmem:[#allocation11 + $0x294] sm:$0xf]  ;;  %v2135_v45 = vor.u32 %v2525_v37, %v2132_v38 }
 0x21f   :  { %v718_v59 = vadd.f32 %v717_v56, %v544_v49  ;;  %v2534_v49 = vld [vmem:[#allocation11 + $0x254] sm:$0xf0]  ;;  %v2167_v56 = vor.u32 %v2533_v53, %v2164_v54  ;;  %v2199_v50 = vor.u32 %v2541_v39, %v2196_v40  ;;  %v2124_v53 = vld [vmem:[#allocation11 + $0x208] sm:$0xf0]  ;;  %v2569_v35 = vld [vmem:[#allocation11 + $0x374] sm:$0xf] }
 0x220   :  { %v2163_v51 = vor.u32 %v2534_v49, %v2162_v47  ;;  %v2524_v47 = vld [vmem:[#allocation11 + $0x204] sm:$0xf0]  ;;  %v2186_v49 = vld [vmem:[#allocation11 + $0x280] sm:$0xf]  ;;  %v2585_v38 = vld [vmem:[#allocation11 + $0x3f4] sm:$0xf] }
 0x221   :  { %v731_v61 = vadd.f32 %v730_v57, %v718_v59  ;;  %v745_v1 = vpop.f32.mrf.mxu0  ;;  %v758_v62 = vpop.f32.mrf.mxu1  ;;  %v2549_v57 = vld [vmem:[#allocation11 + $0x2d4] sm:$0xf]  ;;  %1284 = vmatpush.bf16.msrb.mxu0 %v2167_v56  ;;  %v2188_v56 = vld [vmem:[#allocation11 + $0x288] sm:$0xf0]  ;;  %v2373_v39 = vld [vmem:[#allocation11 + $0x3f8] sm:$0xf0] }
 0x222   :  { %1258 = vmatpush.bf16.msrb.mxu2 %v2163_v51  ;;  %v2231_v59 = vor.u32 %v2549_v57, %v2228_v58  ;;  %1271 = vmatpush.bf16.msrb.mxu3 %v2227_v55  ;;  %v2218_v1 = vld [vmem:[#allocation11 + $0x2c0] sm:$0xf]  ;;  %v2540_v51 = vld [vmem:[#allocation11 + $0x284] sm:$0xf0]  ;;  %v2539_v55 = vld [vmem:[#allocation11 + $0x284] sm:$0xf]  ;;  %v2123_v57 = vor.u32 %v2524_v47, %v2122_v46  ;;  %v2376_v40 = vor.u32 %v2585_v38, %v2373_v39 }
 0x223   :  { %v760_v63 = vpack.c.bf16 %v757_v60, %v731_v61  ;;  %v2154_v60 = vld [vmem:[#allocation11 + $0x240] sm:$0xf]  ;;  %v2532_v61 = vld [vmem:[#allocation11 + $0x244] sm:$0xf0]  ;;  %v2301_v46 = vld [vmem:[#allocation11 + $0x368] sm:$0xf0] }
 0x224   :  { %1297 = vmatpush.bf16.msrb.mxu1 %v2231_v59  ;;  %v2155_v62 = vor.u32 %v2532_v61, %v2154_v60  ;;  %v2187_v59 = vor.u32 %v2540_v51, %v2186_v49  ;;  %v2127_v60 = vor.u32 %v2523_v52, %v2124_v53  ;;  %v2365_v51 = vld [vmem:[#allocation11 + $0x3e8] sm:$0xf0]  ;;  %v2291_v53 = vld [vmem:[#allocation11 + $0x350] sm:$0xf]  ;;  %v2558_v38 = vld [vmem:[#allocation11 + $0x314] sm:$0xf0] }
 0x225   :  { %v761_v2 = vunpack.c.l.bf16 %v760_v63  ;;  %v762_v3 = vunpack.c.h.bf16 %v760_v63  ;;  %v2548_v63 = vld [vmem:[#allocation11 + $0x2c4] sm:$0xf0]  ;;  %v2323_v39 = vld [vmem:[#allocation11 + $0x390] sm:$0xf] }
 0x226   :  { %v719_v4 = vpop.f32.mrf.mxu2  ;;  %v732_v5 = vpop.f32.mrf.mxu3  ;;  %1259 = vmatpush.bf16.msrb.mxu2 %v2155_v62  ;;  %v2191_v62 = vor.u32 %v2539_v55, %v2188_v56  ;;  %v2355_v55 = vld [vmem:[#allocation11 + $0x3d0] sm:$0xf] }
 0x227   :  { %v763_v16 = vmul.f32 0.5, %v761_v2  ;;  %v764_v17 = vmul.f32 0.5, %v762_v3  ;;  %v2531_v2 = vld [vmem:[#allocation11 + $0x244] sm:$0xf]  ;;  %v2156_v3 = vld [vmem:[#allocation11 + $0x248] sm:$0xf0]  ;;  %v2219_v4 = vor.u32 %v2548_v63, %v2218_v1 }
 0x228   :  { %v2159_v5 = vor.u32 %v2531_v2, %v2156_v3 }
 0x229   :  { %v765_v6 = vpack.c.bf16 %v764_v17, %v763_v16  ;;  %v2547_v16 = vld [vmem:[#allocation11 + $0x2c4] sm:$0xf]  ;;  %v2220_v17 = vld [vmem:[#allocation11 + $0x2c8] sm:$0xf0]  ;;  %1272 = vmatpush.bf16.msrb.mxu3 %v2219_v4 }
 0x22a   :  { %1285 = vmatpush.bf16.msrb.mxu0 %v2159_v5 }
 0x22b   :  { %v766_v7 = vunpack.c.l.bf16 %v765_v6  ;;  %v767_v10 = vunpack.c.h.bf16 %v765_v6  ;;  %v2146_v6 = vld [vmem:[#allocation11 + $0x230] sm:$0xf] }
 0x22d   :  { %2630 = vtanh.f32 %v766_v7 }
 0x22e   :  { %2632 = vtanh.f32 %v767_v10 }
 0x233   :  { %v2631_v12 = vpop.eup %2630 }
 0x234   :  { %v2633_v13 = vpop.eup %2632 }
 0x235   :  { %v770_v14 = vpack.c.bf16 %v2633_v13, %v2631_v12  ;;  %v2210_v12 = vld [vmem:[#allocation11 + $0x2b0] sm:$0xf]  ;;  %v2546_v13 = vld [vmem:[#allocation11 + $0x2b4] sm:$0xf0] }
 0x237   :  { %v771_v15 = vunpack.c.l.bf16 %v770_v14  ;;  %v772_v18 = vunpack.c.h.bf16 %v770_v14 }
 0x239   :  { %v773_v19 = vadd.f32 1.0, %v771_v15  ;;  %v774_v20 = vadd.f32 1.0, %v772_v18  ;;  %v2211_v15 = vor.u32 %v2546_v13, %v2210_v12  ;;  %v2529_v18 = vld [vmem:[#allocation11 + $0x234] sm:$0xf] }
 0x23b   :  { %v775_v21 = vpack.c.bf16 %v774_v20, %v773_v19  ;;  %v2148_v19 = vld [vmem:[#allocation11 + $0x238] sm:$0xf0]  ;;  %v2545_v20 = vld [vmem:[#allocation11 + $0x2b4] sm:$0xf]  ;;  %1273 = vmatpush.bf16.msrb.mxu3 %v2211_v15 }
 0x23d   :  { %v776_v22 = vunpack.c.l.bf16 %v775_v21  ;;  %v777_v8 = vunpack.c.h.bf16 %v775_v21  ;;  %v2151_v21 = vor.u32 %v2529_v18, %v2148_v19 }
 0x23f   :  { %v778_v11 = vmul.f32 %v776_v22, %v766_v7  ;;  %v779_v0 = vmul.f32 %v777_v8, %v767_v10  ;;  %v2223_v7 = vor.u32 %v2547_v16, %v2220_v17  ;;  %v2530_v10 = vld [vmem:[#allocation11 + $0x234] sm:$0xf0]  ;;  %v2212_v22 = vld [vmem:[#allocation11 + $0x2b8] sm:$0xf0]  ;;  %v2138_v8 = vld [vmem:[#allocation11 + $0x220] sm:$0xf]  ;;  %1286 = vmatpush.bf16.msrb.mxu0 %v2151_v21 }
 0x240   :  { %v2147_v14 = vor.u32 %v2530_v10, %v2146_v6 }
 0x241   :  { %v780_v23 = vpack.c.bf16 %v778_v11, %v778_v11  ;;  %v781_v24 = vpack.c.bf16 %v779_v0, %v779_v0  ;;  %1298 = vmatpush.bf16.msrb.mxu1 %v2223_v7  ;;  %v2528_v11 = vld [vmem:[#allocation11 + $0x224] sm:$0xf0]  ;;  %v1990_v0 = vld [vmem:[%s3057_s8 + $0x2] sm:$0x3] }
 0x242   :  { %1260 = vmatpush.bf16.msrb.mxu2 %v2147_v14  ;;  %v2139_v26 = vor.u32 %v2528_v11, %v2138_v8  ;;  %v819_v32 = vperm.slane %v1990_v0, 1  ;;  %v818_v54 = vperm.slane %v1990_v0, 0 }
 0x243   :  { %990 = vmatmul.bf16.vlgmr.msra.gmra.mxu2 %v780_v23  ;;  %1003 = vmatmul.bf16.vlgmr.msra.gmra.mxu3 %v781_v24 }
 0x244   :  { %1016 = vmatmul.bf16.vlgmr.msra.gmra.mxu0 %v780_v23  ;;  %1029 = vmatmul.bf16.vlgmr.msra.gmra.mxu1 %v781_v24  ;;  %v2215_v23 = vor.u32 %v2545_v20, %v2212_v22  ;;  %v2202_v24 = vld [vmem:[#allocation11 + $0x2a0] sm:$0xf] }
 0x245   :  { %v2203_v30 = vor.u32 %v2544_v48, %v2202_v24  ;;  %1287 = vmatpush.bf16.msrb.mxu0 %v2143_v31  ;;  %v2371_v31 = vld [vmem:[#allocation11 + $0x3f0] sm:$0xf] }
 0x246   :  { %1299 = vmatpush.bf16.msrb.mxu1 %v2215_v23  ;;  %1261 = vmatpush.bf16.msrb.mxu2 %v2139_v26  ;;  %v2372_v36 = vor.u32 %v2586_v34, %v2371_v31  ;;  %v2575_v34 = vld [vmem:[#allocation11 + $0x3a4] sm:$0xf] }
 0x247   :  { %1274 = vmatpush.bf16.msrb.mxu3 %v2203_v30  ;;  %v2570_v30 = vld [vmem:[#allocation11 + $0x374] sm:$0xf0] }
 0x248   :  { %v2308_v33 = vor.u32 %v2570_v30, %v2307_v28  ;;  %v2576_v28 = vld [vmem:[#allocation11 + $0x3a4] sm:$0xf0]  ;;  %v2559_v30 = vld [vmem:[#allocation11 + $0x324] sm:$0xf] }
 0x249   :  { %1288 = vmatpush.bf16.msrb.mxu0 %v2135_v45  ;;  %v2567_v45 = vld [vmem:[#allocation11 + $0x364] sm:$0xf] }
 0x24a   :  { %1300 = vmatpush.bf16.msrb.mxu1 %v2207_v9  ;;  %1262 = vmatpush.bf16.msrb.mxu2 %v2131_v41  ;;  %v2309_v9 = vld [vmem:[#allocation11 + $0x378] sm:$0xf0]  ;;  %v2568_v41 = vld [vmem:[#allocation11 + $0x364] sm:$0xf0]  ;;  %v2304_v49 = vor.u32 %v2567_v45, %v2301_v46 }
 0x24b   :  { %1275 = vmatpush.bf16.msrb.mxu3 %v2195_v44  ;;  %v2312_v37 = vor.u32 %v2569_v35, %v2309_v9  ;;  %v2584_v44 = vld [vmem:[#allocation11 + $0x3e4] sm:$0xf0]  ;;  %v2333_v35 = vld [vmem:[#allocation11 + $0x3a8] sm:$0xf0] }
 0x24d   :  { %1289 = vmatpush.bf16.msrb.mxu0 %v2127_v60 }
 0x24e   :  { %1301 = vmatpush.bf16.msrb.mxu1 %v2199_v50  ;;  %1263 = vmatpush.bf16.msrb.mxu2 %v2123_v57  ;;  %v2583_v50 = vld [vmem:[#allocation11 + $0x3e4] sm:$0xf]  ;;  %v2582_v57 = vld [vmem:[#allocation11 + $0x3d4] sm:$0xf0] }
 0x24f   :  { %1276 = vmatpush.bf16.msrb.mxu3 %v2187_v59  ;;  %v2368_v52 = vor.u32 %v2583_v50, %v2365_v51  ;;  %v2293_v59 = vld [vmem:[#allocation11 + $0x358] sm:$0xf0]  ;;  %v2356_v60 = vor.u32 %v2582_v57, %v2355_v55  ;;  %v2555_v57 = vld [vmem:[#allocation11 + $0x304] sm:$0xf] }
 0x251   :  { %1556 = vmatpush.bf16.msra.mxu0 %v2312_v37  ;;  %v2259_v37 = vld [vmem:[#allocation11 + $0x310] sm:$0xf] }
 0x252   :  { %1302 = vmatpush.bf16.msrb.mxu1 %v2191_v62  ;;  %1530 = vmatpush.bf16.msra.mxu2 %v2308_v33  ;;  %v2357_v62 = vld [vmem:[#allocation11 + $0x3d8] sm:$0xf0]  ;;  %v2269_v33 = vld [vmem:[#allocation11 + $0x328] sm:$0xf0]  ;;  %v2260_v46 = vor.u32 %v2558_v38, %v2259_v37  ;;  %v2601_v37 = vld [vmem:[#allocation13 + $0x70] sm:$0xff] }
 0x253   :  { %1543 = vmatpush.bf16.msra.mxu3 %v2372_v36  ;;  %v2272_v36 = vor.u32 %v2559_v30, %v2269_v33  ;;  %v2592_v38 = vld [vmem:[#allocation13 + $0x28] sm:$0xff] }
 0x255   :  { %1557 = vmatpush.bf16.msra.mxu0 %v2304_v49 }
 0x256   :  { %1569 = vmatpush.bf16.msra.mxu1 %v2376_v40  ;;  %v2336_v40 = vor.u32 %v2575_v34, %v2333_v35  ;;  %v2594_v35 = vld [vmem:[#allocation13 + $0x38] sm:$0xff] }
 0x25a   :  { %1570 = vmatpush.bf16.msra.mxu1 %v2368_v52  ;;  %v2251_v52 = vld [vmem:[#allocation11 + $0x300] sm:$0xf] }
 0x2c1   :  { %v1017_v42 = vpop.f32.mrf.mxu0  ;;  %v1030_v43 = vpop.f32.mrf.mxu1 }
 0x2c2   :  { %v1018_v58 = vadd.f32 %v1017_v42, %v819_v32  ;;  %v2299_v32 = vld [vmem:[#allocation11 + $0x360] sm:$0xf] }
 0x2c3   :  { %v2363_v42 = vld [vmem:[#allocation11 + $0x3e0] sm:$0xf] }
 0x2c4   :  { %v1031_v2 = vadd.f32 %v1030_v43, %v1018_v58  ;;  %v2300_v43 = vor.u32 %v2568_v41, %v2299_v32  ;;  %v2364_v47 = vor.u32 %v2584_v44, %v2363_v42  ;;  %v2565_v58 = vld [vmem:[#allocation11 + $0x354] sm:$0xf]  ;;  %v2574_v32 = vld [vmem:[#allocation11 + $0x394] sm:$0xf0]  ;;  %v2261_v42 = vld [vmem:[#allocation11 + $0x318] sm:$0xf0] }
 0x2c5   :  { %v2557_v41 = vld [vmem:[#allocation11 + $0x314] sm:$0xf]  ;;  %v2325_v44 = vld [vmem:[#allocation11 + $0x398] sm:$0xf0]  ;;  %v2324_v50 = vor.u32 %v2574_v32, %v2323_v39  ;;  %v2600_v39 = vld [vmem:[#allocation13 + $0x68] sm:$0xff] }
 0x2c6   :  { %v991_v61 = vpop.f32.mrf.mxu2  ;;  %v1004_v1 = vpop.f32.mrf.mxu3  ;;  %1531 = vmatpush.bf16.msra.mxu2 %v2300_v43  ;;  %1544 = vmatpush.bf16.msra.mxu3 %v2364_v47  ;;  %v2573_v43 = vld [vmem:[#allocation11 + $0x394] sm:$0xf]  ;;  %v2264_v51 = vor.u32 %v2557_v41, %v2261_v42  ;;  %v2599_v32 = vld [vmem:[#allocation13 + $0x60] sm:$0xff]  ;;  %v2590_v41 = vld [vmem:[#allocation13 + $0x18] sm:$0xff] }
 0x2c7   :  { %v992_v63 = vadd.f32 %v991_v61, %v818_v54  ;;  %v2566_v54 = vld [vmem:[#allocation11 + $0x354] sm:$0xf0]  ;;  %v2296_v61 = vor.u32 %v2565_v58, %v2293_v59  ;;  %v2328_v55 = vor.u32 %v2573_v43, %v2325_v44  ;;  %v2253_v58 = vld [vmem:[#allocation11 + $0x308] sm:$0xf0]  ;;  %v2589_v43 = vld [vmem:[#allocation13 + $0x10] sm:$0xff] }
 0x2c8   :  { %v2292_v56 = vor.u32 %v2566_v54, %v2291_v53  ;;  %v2556_v53 = vld [vmem:[#allocation11 + $0x304] sm:$0xf0]  ;;  %v2315_v54 = vld [vmem:[#allocation11 + $0x380] sm:$0xf]  ;;  %v2598_v42 = vld [vmem:[#allocation13 + $0x58] sm:$0xff] }
 0x2c9   :  { %v1005_v3 = vadd.f32 %v1004_v1, %v992_v63  ;;  %v1019_v4 = vpop.f32.mrf.mxu0  ;;  %v1032_v5 = vpop.f32.mrf.mxu1  ;;  %v2581_v1 = vld [vmem:[#allocation11 + $0x3d4] sm:$0xf]  ;;  %1558 = vmatpush.bf16.msra.mxu0 %v2296_v61  ;;  %v2317_v61 = vld [vmem:[#allocation11 + $0x388] sm:$0xf0] }
 0x2ca   :  { %1532 = vmatpush.bf16.msra.mxu2 %v2292_v56  ;;  %v2360_v63 = vor.u32 %v2581_v1, %v2357_v62  ;;  %1545 = vmatpush.bf16.msra.mxu3 %v2356_v60  ;;  %v2347_v4 = vld [vmem:[#allocation11 + $0x3c0] sm:$0xf]  ;;  %v2572_v56 = vld [vmem:[#allocation11 + $0x384] sm:$0xf0]  ;;  %v2571_v60 = vld [vmem:[#allocation11 + $0x384] sm:$0xf]  ;;  %v2252_v1 = vor.u32 %v2556_v53, %v2251_v52 }
 0x2cb   :  { %v1034_v16 = vpack.c.bf16 %v1031_v2, %v1005_v3  ;;  %v2283_v2 = vld [vmem:[#allocation11 + $0x340] sm:$0xf]  ;;  %v2564_v3 = vld [vmem:[#allocation11 + $0x344] sm:$0xf0]  ;;  %v2597_v44 = vld [vmem:[#allocation13 + $0x50] sm:$0xff] }
 0x2cc   :  { %1571 = vmatpush.bf16.msra.mxu1 %v2360_v63  ;;  %v2284_v5 = vor.u32 %v2564_v3, %v2283_v2  ;;  %v2316_v63 = vor.u32 %v2572_v56, %v2315_v54  ;;  %v2256_v2 = vor.u32 %v2555_v57, %v2253_v58  ;;  %v2587_v53 = vld [vmem:[#allocation13] sm:$0xff] }
 0x2cd   :  { %v1035_v17 = vunpack.c.l.bf16 %v1034_v16  ;;  %v1036_v6 = vunpack.c.h.bf16 %v1034_v16  ;;  %v2580_v16 = vld [vmem:[#allocation11 + $0x3c4] sm:$0xf0]  ;;  %v2595_v54 = vld [vmem:[#allocation13 + $0x40] sm:$0xff] }
 0x2ce   :  { %v993_v7 = vpop.f32.mrf.mxu2  ;;  %v1006_v10 = vpop.f32.mrf.mxu3  ;;  %1533 = vmatpush.bf16.msra.mxu2 %v2284_v5  ;;  %v2320_v5 = vor.u32 %v2571_v60, %v2317_v61 }
 0x2cf   :  { %v1037_v12 = vmul.f32 0.5, %v1035_v17  ;;  %v1038_v13 = vmul.f32 0.5, %v1036_v6  ;;  %v2563_v17 = vld [vmem:[#allocation11 + $0x344] sm:$0xf]  ;;  %v2285_v6 = vld [vmem:[#allocation11 + $0x348] sm:$0xf0]  ;;  %v2348_v7 = vor.u32 %v2580_v16, %v2347_v4 }
 0x2d0   :  { %v2288_v10 = vor.u32 %v2563_v17, %v2285_v6 }
 0x2d1   :  { %v1039_v14 = vpack.c.bf16 %v1038_v13, %v1037_v12  ;;  %v2579_v12 = vld [vmem:[#allocation11 + $0x3c4] sm:$0xf]  ;;  %v2349_v13 = vld [vmem:[#allocation11 + $0x3c8] sm:$0xf0]  ;;  %1546 = vmatpush.bf16.msra.mxu3 %v2348_v7 }
 0x2d2   :  { %1559 = vmatpush.bf16.msra.mxu0 %v2288_v10 }
 0x2d3   :  { %v1040_v15 = vunpack.c.l.bf16 %v1039_v14  ;;  %v1041_v18 = vunpack.c.h.bf16 %v1039_v14  ;;  %v2275_v14 = vld [vmem:[#allocation11 + $0x330] sm:$0xf] }
 0x2d5   :  { %2634 = vtanh.f32 %v1040_v15 }
 0x2d6   :  { %2636 = vtanh.f32 %v1041_v18 }
 0x2db   :  { %v2635_v19 = vpop.eup %2634 }
 0x2dc   :  { %v2637_v20 = vpop.eup %2636 }
 0x2dd   :  { %v1044_v21 = vpack.c.bf16 %v2637_v20, %v2635_v19  ;;  %v2339_v19 = vld [vmem:[#allocation11 + $0x3b0] sm:$0xf]  ;;  %v2578_v20 = vld [vmem:[#allocation11 + $0x3b4] sm:$0xf0] }
 0x2df   :  { %v1045_v22 = vunpack.c.l.bf16 %v1044_v21  ;;  %v1046_v8 = vunpack.c.h.bf16 %v1044_v21 }
 0x2e1   :  { %v1047_v11 = vadd.f32 1.0, %v1045_v22  ;;  %v1048_v0 = vadd.f32 1.0, %v1046_v8  ;;  %v2340_v22 = vor.u32 %v2578_v20, %v2339_v19  ;;  %v2561_v8 = vld [vmem:[#allocation11 + $0x334] sm:$0xf] }
 0x2e3   :  { %v1049_v23 = vpack.c.bf16 %v1048_v0, %v1047_v11  ;;  %v2277_v11 = vld [vmem:[#allocation11 + $0x338] sm:$0xf0]  ;;  %v2577_v0 = vld [vmem:[#allocation11 + $0x3b4] sm:$0xf]  ;;  %1547 = vmatpush.bf16.msra.mxu3 %v2340_v22 }
 0x2e5   :  { %v1050_v24 = vunpack.c.l.bf16 %v1049_v23  ;;  %v1051_v48 = vunpack.c.h.bf16 %v1049_v23  ;;  %v2280_v23 = vor.u32 %v2561_v8, %v2277_v11 }
 0x2e7   :  { %v1052_v25 = vmul.f32 %v1050_v24, %v1040_v15  ;;  %v1053_v26 = vmul.f32 %v1051_v48, %v1041_v18  ;;  %v2352_v15 = vor.u32 %v2579_v12, %v2349_v13  ;;  %v2562_v18 = vld [vmem:[#allocation11 + $0x334] sm:$0xf0]  ;;  %v2341_v24 = vld [vmem:[#allocation11 + $0x3b8] sm:$0xf0]  ;;  %v2267_v48 = vld [vmem:[#allocation11 + $0x320] sm:$0xf]  ;;  %1560 = vmatpush.bf16.msra.mxu0 %v2280_v23 }
 0x2e8   :  { %v2276_v21 = vor.u32 %v2562_v18, %v2275_v14 }
 0x2e9   :  { %v1054_v27 = vpack.c.bf16 %v1052_v25, %v1052_v25  ;;  %v1055_v29 = vpack.c.bf16 %v1053_v26, %v1053_v26  ;;  %1572 = vmatpush.bf16.msra.mxu1 %v2352_v15  ;;  %v2560_v25 = vld [vmem:[#allocation11 + $0x324] sm:$0xf0]  ;;  %v2119_v26 = vld [vmem:[%s3057_s8 + $0x4] sm:$0x3] }
 0x2ea   :  { %1534 = vmatpush.bf16.msra.mxu2 %v2276_v21  ;;  %v2268_v31 = vor.u32 %v2560_v25, %v2267_v48  ;;  %v1093_v45 = vperm.slane %v2119_v26, 1  ;;  %v1092_v59 = vperm.slane %v2119_v26, 0 }
 0x2eb   :  { %1264 = vmatmul.bf16.vlgmr.msrb.gmra.mxu2 %v1054_v27  ;;  %1277 = vmatmul.bf16.vlgmr.msrb.gmra.mxu3 %v1055_v29 }
 0x2ec   :  { %1290 = vmatmul.bf16.vlgmr.msrb.gmra.mxu0 %v1054_v27  ;;  %1303 = vmatmul.bf16.vlgmr.msrb.gmra.mxu1 %v1055_v29  ;;  %v2344_v27 = vor.u32 %v2577_v0, %v2341_v24  ;;  %v2331_v29 = vld [vmem:[#allocation11 + $0x3a0] sm:$0xf] }
 0x2ed   :  { %v2332_v9 = vor.u32 %v2576_v28, %v2331_v29  ;;  %1561 = vmatpush.bf16.msra.mxu0 %v2272_v36  ;;  %v2593_v36 = vld [vmem:[#allocation13 + $0x30] sm:$0xff] }
 0x2ee   :  { %1573 = vmatpush.bf16.msra.mxu1 %v2344_v27  ;;  %1535 = vmatpush.bf16.msra.mxu2 %v2268_v31 }
 0x2ef   :  { %1548 = vmatpush.bf16.msra.mxu3 %v2332_v9  ;;  %v2602_v9 = vld [vmem:[#allocation13 + $0x78] sm:$0xff] }
 0x2f1   :  { %1562 = vmatpush.bf16.msra.mxu0 %v2264_v51 }
 0x2f2   :  { %1574 = vmatpush.bf16.msra.mxu1 %v2336_v40  ;;  %1536 = vmatpush.bf16.msra.mxu2 %v2260_v46  ;;  %v2591_v40 = vld [vmem:[#allocation13 + $0x20] sm:$0xff]  ;;  %v2588_v46 = vld [vmem:[#allocation13 + $0x8] sm:$0xff] }
 0x2f3   :  { %1549 = vmatpush.bf16.msra.mxu3 %v2324_v50 }
 0x2f5   :  { %1563 = vmatpush.bf16.msra.mxu0 %v2256_v2 }
 0x2f6   :  { %1575 = vmatpush.bf16.msra.mxu1 %v2328_v55  ;;  %1537 = vmatpush.bf16.msra.mxu2 %v2252_v1 }
 0x2f7   :  { %1550 = vmatpush.bf16.msra.mxu3 %v2316_v63 }
 0x2fa   :  { %1576 = vmatpush.bf16.msra.mxu1 %v2320_v5  ;;  %1736 = vmatpush.bf16.msrb.mxu2 %v2594_v35 }
 0x2fb   :  { %1749 = vmatpush.bf16.msrb.mxu3 %v2602_v9 }
 0x2fe   :  { %1737 = vmatpush.bf16.msrb.mxu2 %v2593_v36 }
 0x2ff   :  { %1750 = vmatpush.bf16.msrb.mxu3 %v2601_v37 }
 0x302   :  { %1738 = vmatpush.bf16.msrb.mxu2 %v2592_v38 }
 0x303   :  { %1751 = vmatpush.bf16.msrb.mxu3 %v2600_v39 }
 0x306   :  { %1739 = vmatpush.bf16.msrb.mxu2 %v2591_v40 }
 0x307   :  { %1752 = vmatpush.bf16.msrb.mxu3 %v2599_v32 }
 0x30a   :  { %1740 = vmatpush.bf16.msrb.mxu2 %v2590_v41 }
 0x30b   :  { %1753 = vmatpush.bf16.msrb.mxu3 %v2598_v42 }
 0x30e   :  { %1741 = vmatpush.bf16.msrb.mxu2 %v2589_v43 }
 0x30f   :  { %1754 = vmatpush.bf16.msrb.mxu3 %v2597_v44 }
 0x312   :  { %1742 = vmatpush.bf16.msrb.mxu2 %v2588_v46 }
 0x316   :  { %1743 = vmatpush.bf16.msrb.mxu2 %v2587_v53 }
 0x369   :  { %v1291_v47 = vpop.f32.mrf.mxu0  ;;  %v1304_v49 = vpop.f32.mrf.mxu1 }
 0x36a   :  { %v1292_v62 = vadd.f32 %v1291_v47, %v1093_v45  ;;  %v2248_v45 = vld [vmem:[%s3057_s8 + $0x6] sm:$0x3]  ;;  %v2596_v47 = vld [vmem:[#allocation13 + $0x48] sm:$0xff] }
 0x36b   :  { %v1366_v52 = vperm.slane %v2248_v45, 0  ;;  %1755 = vmatpush.bf16.msrb.mxu3 %v2596_v47 }
 0x36c   :  { %v1305_v17 = vadd.f32 %v1304_v49, %v1292_v62  ;;  %v1367_v49 = vperm.slane %v2248_v45, 1 }
 0x36e   :  { %v1265_v3 = vpop.f32.mrf.mxu2  ;;  %v1278_v4 = vpop.f32.mrf.mxu3 }
 0x36f   :  { %v1266_v16 = vadd.f32 %v1265_v3, %v1092_v59  ;;  %1756 = vmatpush.bf16.msrb.mxu3 %v2595_v54 }
 0x371   :  { %v1279_v6 = vadd.f32 %v1278_v4, %v1266_v16  ;;  %v1293_v7 = vpop.f32.mrf.mxu0  ;;  %v1306_v10 = vpop.f32.mrf.mxu1 }
 0x373   :  { %v1308_v12 = vpack.c.bf16 %v1305_v17, %v1279_v6 }
 0x375   :  { %v1309_v13 = vunpack.c.l.bf16 %v1308_v12  ;;  %v1310_v14 = vunpack.c.h.bf16 %v1308_v12 }
 0x376   :  { %v1267_v15 = vpop.f32.mrf.mxu2  ;;  %v1280_v18 = vpop.f32.mrf.mxu3 }
 0x377   :  { %v1311_v19 = vmul.f32 0.5, %v1309_v13  ;;  %v1312_v20 = vmul.f32 0.5, %v1310_v14 }
 0x379   :  { %v1313_v21 = vpack.c.bf16 %v1312_v20, %v1311_v19 }
 0x37b   :  { %v1314_v22 = vunpack.c.l.bf16 %v1313_v21  ;;  %v1315_v8 = vunpack.c.h.bf16 %v1313_v21 }
 0x37d   :  { %2638 = vtanh.f32 %v1314_v22 }
 0x37e   :  { %2640 = vtanh.f32 %v1315_v8 }
 0x383   :  { %v2639_v11 = vpop.eup %2638 }
 0x384   :  { %v2641_v0 = vpop.eup %2640 }
 0x385   :  { %v1318_v23 = vpack.c.bf16 %v2641_v0, %v2639_v11 }
 0x387   :  { %v1319_v24 = vunpack.c.l.bf16 %v1318_v23  ;;  %v1320_v48 = vunpack.c.h.bf16 %v1318_v23 }
 0x389   :  { %v1321_v25 = vadd.f32 1.0, %v1319_v24  ;;  %v1322_v26 = vadd.f32 1.0, %v1320_v48  ;;  %v2625_v24 = vld [vmem:[%s3059_s10] ss:$0 sm:$0xff] }
 0x38b   :  { %v1323_v27 = vpack.c.bf16 %v1322_v26, %v1321_v25 }
 0x38d   :  { %v1324_v29 = vunpack.c.l.bf16 %v1323_v27  ;;  %v1325_v28 = vunpack.c.h.bf16 %v1323_v27 }
 0x38f   :  { %v1326_v30 = vmul.f32 %v1324_v29, %v1314_v22  ;;  %v1327_v31 = vmul.f32 %v1325_v28, %v1315_v8 }
 0x391   :  { %v1328_v33 = vpack.c.bf16 %v1326_v30, %v1326_v30  ;;  %v1329_v34 = vpack.c.bf16 %v1327_v31, %v1327_v31 }
 0x393   :  { %1538 = vmatmul.bf16.vlgmr.msra.gmra.mxu2 %v1328_v33  ;;  %1551 = vmatmul.bf16.vlgmr.msra.gmra.mxu3 %v1329_v34 }
 0x394   :  { %1564 = vmatmul.bf16.vlgmr.msra.gmra.mxu0 %v1328_v33  ;;  %1577 = vmatmul.bf16.vlgmr.msra.gmra.mxu1 %v1329_v34 }
 0x411   :  { %v1565_v50 = vpop.f32.mrf.mxu0  ;;  %v1578_v51 = vpop.f32.mrf.mxu1 }
 0x412   :  { %v1566_v55 = vadd.f32 %v1565_v50, %v1367_v49 }
 0x414   :  { %v1579_v59 = vadd.f32 %v1578_v51, %v1566_v55 }
 0x416   :  { %v1539_v56 = vpop.f32.mrf.mxu2  ;;  %v1552_v57 = vpop.f32.mrf.mxu3 }
 0x417   :  { %v1540_v58 = vadd.f32 %v1539_v56, %v1366_v52 }
 0x419   :  { %v1553_v60 = vadd.f32 %v1552_v57, %v1540_v58  ;;  %v1567_v61 = vpop.f32.mrf.mxu0  ;;  %v1580_v1 = vpop.f32.mrf.mxu1 }
 0x41b   :  { %v1582_v62 = vpack.c.bf16 %v1579_v59, %v1553_v60 }
 0x41d   :  { %v1583_v63 = vunpack.c.l.bf16 %v1582_v62  ;;  %v1584_v2 = vunpack.c.h.bf16 %v1582_v62 }
 0x41e   :  { %v1541_v3 = vpop.f32.mrf.mxu2  ;;  %v1554_v4 = vpop.f32.mrf.mxu3 }
 0x41f   :  { %v1585_v5 = vmul.f32 0.5, %v1583_v63  ;;  %v1586_v16 = vmul.f32 0.5, %v1584_v2 }
 0x421   :  { %v1587_v17 = vpack.c.bf16 %v1586_v16, %v1585_v5 }
 0x423   :  { %v1588_v6 = vunpack.c.l.bf16 %v1587_v17  ;;  %v1589_v7 = vunpack.c.h.bf16 %v1587_v17 }
 0x425   :  { %2642 = vtanh.f32 %v1588_v6 }
 0x426   :  { %2644 = vtanh.f32 %v1589_v7 }
 0x42b   :  { %v2643_v10 = vpop.eup %2642 }
 0x42c   :  { %v2645_v12 = vpop.eup %2644 }
 0x42d   :  { %v1592_v13 = vpack.c.bf16 %v2645_v12, %v2643_v10 }
 0x42f   :  { %v1593_v14 = vunpack.c.l.bf16 %v1592_v13  ;;  %v1594_v15 = vunpack.c.h.bf16 %v1592_v13 }
 0x431   :  { %v1595_v18 = vadd.f32 1.0, %v1593_v14  ;;  %v1596_v19 = vadd.f32 1.0, %v1594_v15 }
 0x433   :  { %v1597_v20 = vpack.c.bf16 %v1596_v19, %v1595_v18 }
 0x435   :  { %v1598_v21 = vunpack.c.l.bf16 %v1597_v20  ;;  %v1599_v22 = vunpack.c.h.bf16 %v1597_v20 }
 0x437   :  { %v1600_v8 = vmul.f32 %v1598_v21, %v1588_v6  ;;  %v1601_v11 = vmul.f32 %v1599_v22, %v1589_v7 }
 0x439   :  { %v1602_v0 = vpack.c.bf16 %v1600_v8, %v1600_v8  ;;  %v1603_v23 = vpack.c.bf16 %v1601_v11, %v1601_v11 }
 0x43b   :  { %1744 = vmatmul.bf16.vlgmr.msrb.gmra.mxu2 %v1602_v0  ;;  %1757 = vmatmul.bf16.vlgmr.msrb.gmra.mxu3 %v1603_v23 }
 0x4be   :  { %v1745_v48 = vpop.f32.mrf.mxu2  ;;  %v1758_v25 = vpop.f32.mrf.mxu3 }
 0x4bf   :  { %v1746_v26 = vadd.f32 %v2625_v24, %v1745_v48 }
 0x4c1   :  { %v1759_v27 = vadd.f32 %v1758_v25, %v1746_v26 }
 0x4c3   :  { %2646 = vtanh.f32 %v1759_v27 }
 0x4c6   :  { %v1747_v29 = vpop.f32.mrf.mxu2  ;;  %v1760_v28 = vpop.f32.mrf.mxu3 }
 0x4c9   :  { %v2647_v30 = vpop.eup %2646 }
 0x4ca   :  { %v1763_v31 = vpack.c.bf16 %v2647_v30, %v2647_v30 }
 0x4cc   :  { %1764 = vst [vmem:[#allocation14] sm:$0xf] %v1763_v31 }
 0x4cd   :  { %1775 = dma.vmem_to_hbm [thread:$0]  %s1771_s20, 64, %s1773_s23, [#allocation4]  }
 0x4ce   :  { %2848 = dma.done.wait [#allocation4], 64  }
 0x4cf   :  { %2849 = vsyncadd [#allocation4], 4294967232 }
 0x4d0   :  { %1780 = vsyncpa [#allocation3], 1 }
 0x4d1   :  { %1781 = vsyncpa [#allocation6], 1 }
 0x4d2   :  { %1782 = vsyncpa [#allocation9], 1 }
 0x4d3   :  { %1783 = vsyncpa [#allocation12], 1 }
 0x4d4   :  { %1784 = vsyncpa [#allocation4], 1 }

</bundles_post_ra>
